<compile_context>
chip_gen: v6e
topology: v6e:2x2x1
jax: 0.10.0
libtpu: 0.0.40
codegen_flags: <defaults>
</compile_context>

<pallas_src>
import functools

import jax
import jax.numpy as jnp
from jax import lax
from jax.experimental import pallas as pl
from jax.experimental.pallas import tpu as pltpu

# ---- synthetic config (mirrors config['lstm'] / vocab / Tag_space sizes) ----
EMBEDDING_DIM = 16
HIDDEN_DIM = 32
NUM_LAYERS = 2
DROPOUT_P = 0.1            # inference: dropout layers are identity
VOCAB_SIZE = 50
NUM_TAGS = 9               # len(Tag_space)
NUM_CLASSES = NUM_TAGS + 3 # dense output dim
IGNORE_INDEX = NUM_TAGS    # CrossEntropyLoss(ignore_index=len(Tag_space))
CPAD = 128                 # lane-dense padded class dimension (12 -> 128)
NEG_BIG = -1e30            # finite "-inf" for padded class lanes


# ------------------------------ fused kernel --------------------------------
def _fused_forward_kernel(*refs, num_layers, ignore_index, batch, seq, hidden):
    """Fused LSTM_Model forward, all rows time-major (row n = t*B + b).

    refs = (ids (N,1) i32, labels (N,1) i32, emb (V,E),
            [w_ih_l (in,4H), w_hh_l (H,4H), b_l (1,4H)] * num_layers,
            dense_w_pad (H,CPAD), dense_b_pad (1,CPAD),           # inputs
            logp_out (N,CPAD), loss_out (1,1))                    # outputs
    Weights are pre-transposed vs. PyTorch; b_l = bias_ih + bias_hh.
    """
    ids_ref, labels_ref, emb_ref = refs[:3]
    layer_refs = refs[3:3 + 3 * num_layers]
    dw_ref, db_ref, logp_ref, loss_ref = refs[3 + 3 * num_layers:]

    B, S, H = batch, seq, hidden
    N = B * S
    V = emb_ref.shape[0]
    Cpad = logp_ref.shape[-1]

    # ---- embedding gather as one-hot matmul (keeps the gather on the MXU) ----
    ids = ids_ref[...]                                            # (N, 1) int32
    vocab_ids = lax.broadcasted_iota(jnp.int32, (N, V), 1)
    onehot = (vocab_ids == ids).astype(jnp.float32)               # (N, V)
    x = jnp.dot(onehot, emb_ref[...],
                preferred_element_type=jnp.float32)               # (N, E) time-major
    # TODO(synk): training-mode dropout masks (nn.Dropout / LSTM inter-layer
    # dropout) are not implemented; they are identity at inference.

    # Hoisted constants (never recomputed inside the recurrence).
    lane4h = lax.broadcasted_iota(jnp.int32, (B, 4 * H), 1)
    g_lane = (lane4h >= 2 * H) & (lane4h < 3 * H)                 # tanh-gate lanes

    for layer in range(num_layers):
        # Weight loads hoisted out of the time loop (stay resident in vregs).
        w_ih = layer_refs[3 * layer][...]
        w_hh = layer_refs[3 * layer + 1][...]
        b = layer_refs[3 * layer + 2][...]
        # Input projection for the whole sequence: one MXU matmul off the
        # serial critical path; bias folded in once.
        gx = jnp.dot(x, w_ih, preferred_element_type=jnp.float32) + b   # (N, 4H)
        h = jnp.zeros((B, H), jnp.float32)
        c = jnp.zeros((B, H), jnp.float32)
        hs = []
        # Fully unrolled recurrence (S is small & static) so the scheduler can
        # overlap the h @ W_hh push with the previous step's VPU/EUP gate work.
        for t in range(S):
            gates = gx[t * B:(t + 1) * B, :] + jnp.dot(
                h, w_hh, preferred_element_type=jnp.float32)      # (B, 4H)
            # One sigmoid + one tanh over the full (B, 4H) vreg; select g lanes.
            act = jnp.where(g_lane, jnp.tanh(gates), jax.nn.sigmoid(gates))
            i_g = act[:, 0:H]
            f_g = act[:, H:2 * H]
            g_g = act[:, 2 * H:3 * H]
            o_g = act[:, 3 * H:4 * H]
            c = f_g * c + i_g * g_g
            h = o_g * jnp.tanh(c)
            hs.append(h)
        x = jnp.concatenate(hs, axis=0)                           # (N, H) time-major

    # ---- dense + log_softmax on a lane-dense (N, 128) slab ----
    logits = jnp.dot(x, dw_ref[...],
                     preferred_element_type=jnp.float32) + db_ref[...]   # (N, CPAD)
    m = jnp.max(logits, axis=-1, keepdims=True)
    s = logits - m
    logp = s - jnp.log(jnp.sum(jnp.exp(s), axis=-1, keepdims=True))
    logp_ref[...] = logp

    # ---- CrossEntropyLoss(ignore_index=...), mean over valid positions ----
    # NOTE: the PyTorch module feeds *log-softmaxed* outputs into CrossEntropyLoss,
    # which applies log_softmax again internally — reproduced exactly here.
    labels = labels_ref[...]                                      # (N, 1) int32
    m2 = jnp.max(logp, axis=-1, keepdims=True)
    s2 = logp - m2
    logp2 = s2 - jnp.log(jnp.sum(jnp.exp(s2), axis=-1, keepdims=True))
    class_ids = lax.broadcasted_iota(jnp.int32, (N, Cpad), 1)
    picked = jnp.where(class_ids == labels, logp2, 0.0)
    per_ex = -jnp.sum(picked, axis=-1, keepdims=True)             # (N, 1)
    valid = (labels != ignore_index).astype(jnp.float32)          # (N, 1)
    total = jnp.sum(per_ex * valid, axis=0, keepdims=True)        # (1, 1)
    count = jnp.sum(valid, axis=0, keepdims=True)                 # (1, 1)
    loss_ref[...] = total / count


# ----------------------------- parameter setup ------------------------------
def init_params(key):
    n_keys = 3 + 4 * NUM_LAYERS
    keys = jax.random.split(key, n_keys)
    params = {}
    params["embedding"] = jax.random.normal(
        keys[0], (VOCAB_SIZE, EMBEDDING_DIM), jnp.float32)
    bound = float(1.0 / (HIDDEN_DIM ** 0.5))
    lstm_params = []
    idx = 1
    for layer in range(NUM_LAYERS):
        in_dim = EMBEDDING_DIM if layer == 0 else HIDDEN_DIM
        w_ih = jax.random.uniform(keys[idx], (in_dim, 4 * HIDDEN_DIM),
                                  jnp.float32, -bound, bound); idx += 1
        w_hh = jax.random.uniform(keys[idx], (HIDDEN_DIM, 4 * HIDDEN_DIM),
                                  jnp.float32, -bound, bound); idx += 1
        b_ih = jax.random.uniform(keys[idx], (4 * HIDDEN_DIM,),
                                  jnp.float32, -bound, bound); idx += 1
        b_hh = jax.random.uniform(keys[idx], (4 * HIDDEN_DIM,),
                                  jnp.float32, -bound, bound); idx += 1
        lstm_params.append((w_ih, w_hh, (b_ih + b_hh).reshape(1, 4 * HIDDEN_DIM)))
    params["lstm"] = lstm_params
    dense_w = jax.random.uniform(keys[idx], (HIDDEN_DIM, NUM_CLASSES),
                                 jnp.float32, -bound, bound); idx += 1
    dense_b = jax.random.uniform(keys[idx], (NUM_CLASSES,),
                                 jnp.float32, -bound, bound)
    params["dense_w"] = dense_w
    params["dense_b"] = dense_b
    # Lane-dense classifier: pad output dim 12 -> 128; padded bias lanes get a
    # large negative value so they vanish under (log_)softmax and CE.
    params["dense_w_pad"] = (jnp.zeros((HIDDEN_DIM, CPAD), jnp.float32)
                             .at[:, :NUM_CLASSES].set(dense_w))
    params["dense_b_pad"] = (jnp.full((1, CPAD), NEG_BIG, jnp.float32)
                             .at[0, :NUM_CLASSES].set(dense_b))
    return params


# ------------------------------ model forward -------------------------------
def lstm_model_forward(params, inputs, labels=None):
    B, S = inputs.shape
    N = B * S
    # Time-major flattening (row n = t*B + b) so the kernel never transposes.
    ids_tm = inputs.astype(jnp.int32).T.reshape(N, 1)
    if labels is None:
        labels_tm = jnp.zeros((N, 1), jnp.int32)   # dummy; loss is discarded
    else:
        labels_tm = labels.astype(jnp.int32).T.reshape(N, 1)

    flat_weights = []
    for (w_ih, w_hh, b) in params["lstm"]:
        flat_weights += [w_ih, w_hh, b]
    num_inputs = 3 + 3 * NUM_LAYERS + 2

    kernel = functools.partial(_fused_forward_kernel,
                               num_layers=NUM_LAYERS, ignore_index=IGNORE_INDEX,
                               batch=B, seq=S, hidden=HIDDEN_DIM)
    logp_pad, loss = pl.pallas_call(
        kernel,
        out_shape=(jax.ShapeDtypeStruct((N, CPAD), jnp.float32),
                   jax.ShapeDtypeStruct((1, 1), jnp.float32)),
        in_specs=[pl.BlockSpec(memory_space=pltpu.MemorySpace.VMEM)] * num_inputs,
        out_specs=(pl.BlockSpec(memory_space=pltpu.MemorySpace.VMEM),
                   pl.BlockSpec(memory_space=pltpu.MemorySpace.VMEM)),
    )(ids_tm, labels_tm, params["embedding"], *flat_weights,
      params["dense_w_pad"], params["dense_b_pad"])

    # Cheap XLA-side unpad + back to batch_first.
    logits = logp_pad.reshape(S, B, CPAD).transpose(1, 0, 2)[:, :, :NUM_CLASSES]
    if labels is not None:
        return logits, loss[0, 0]
    return logits


# ------------------------- pure-JAX reference (check) ------------------------
def reference_forward(params, inputs, labels):
    H = HIDDEN_DIM
    with jax.default_matmul_precision("highest"):
        x = params["embedding"][inputs]                           # (B, S, E)
        B, S, _ = x.shape
        for (w_ih, w_hh, b) in params["lstm"]:
            h = jnp.zeros((B, H), jnp.float32)
            c = jnp.zeros((B, H), jnp.float32)
            outs = []
            for t in range(S):
                g = x[:, t, :] @ w_ih + h @ w_hh + b
                i_g = jax.nn.sigmoid(g[:, 0:H])
                f_g = jax.nn.sigmoid(g[:, H:2 * H])
                g_g = jnp.tanh(g[:, 2 * H:3 * H])
                o_g = jax.nn.sigmoid(g[:, 3 * H:4 * H])
                c = f_g * c + i_g * g_g
                h = o_g * jnp.tanh(c)
                outs.append(h)
            x = jnp.stack(outs, axis=1)                           # (B, S, H)
        logits = x @ params["dense_w"] + params["dense_b"]        # (B, S, C)
        logp = jax.nn.log_softmax(logits, axis=-1)
        logp2 = jax.nn.log_softmax(logp, axis=-1)                 # CE's internal log_softmax
        picked = jnp.take_along_axis(logp2, labels[..., None], axis=-1)[..., 0]
        valid = (labels != IGNORE_INDEX).astype(jnp.float32)
        loss = -jnp.sum(picked * valid) / jnp.sum(valid)
        return logp, loss


# ----------------------------------- main ------------------------------------
if __name__ == "__main__":
    key = jax.random.PRNGKey(0)
    pkey, ikey, lkey = jax.random.split(key, 3)
    params = init_params(pkey)

    batch, seq = 2, 8
    inputs = jax.random.randint(ikey, (batch, seq), 0, VOCAB_SIZE, dtype=jnp.int32)
    labels = jax.random.randint(lkey, (batch, seq), 0, NUM_CLASSES, dtype=jnp.int32)
    labels = labels.at[0, -1].set(IGNORE_INDEX)   # simulate a padded position

    fwd = jax.jit(lstm_model_forward)
    logits, loss = fwd(params, inputs, labels)
    logits = jax.block_until_ready(logits)
    loss = jax.block_until_ready(loss)

    assert logits.shape == (batch, seq, NUM_CLASSES)
    assert bool(jnp.all(jnp.isfinite(logits)))
    assert bool(jnp.isfinite(loss))

    ref_logp, ref_loss = reference_forward(params, inputs, labels)
    assert bool(jnp.allclose(logits, ref_logp, atol=2e-3, rtol=2e-3)), "logits mismatch"
    assert bool(jnp.allclose(loss, ref_loss, atol=2e-3, rtol=2e-3)), "loss mismatch"

    print("KERNEL_OK")
</pallas_src>

<mosaic_0001>
module attributes {stable_mosaic.version = 11 : i64} {
  func.func @_fused_forward_kernel(%arg0: memref<16x1xi32, #tpu.memory_space<vmem>>, %arg1: memref<16x1xi32, #tpu.memory_space<vmem>>, %arg2: memref<50x16xf32, #tpu.memory_space<vmem>>, %arg3: memref<16x128xf32, #tpu.memory_space<vmem>>, %arg4: memref<32x128xf32, #tpu.memory_space<vmem>>, %arg5: memref<1x128xf32, #tpu.memory_space<vmem>>, %arg6: memref<32x128xf32, #tpu.memory_space<vmem>>, %arg7: memref<32x128xf32, #tpu.memory_space<vmem>>, %arg8: memref<1x128xf32, #tpu.memory_space<vmem>>, %arg9: memref<32x128xf32, #tpu.memory_space<vmem>>, %arg10: memref<1x128xf32, #tpu.memory_space<vmem>>, %arg11: memref<16x128xf32, #tpu.memory_space<vmem>>, %arg12: memref<1x1xf32, #tpu.memory_space<vmem>>) attributes {dimension_semantics = [], scalar_prefetch = 0 : i64, scratch_operands = 0 : i64, tpu.core_type = #tpu.core_type<tc>} {
    %c0 = arith.constant 0 : index
    %c0_0 = arith.constant 0 : index
    %0 = vector.load %arg0[%c0, %c0_0] : memref<16x1xi32, #tpu.memory_space<vmem>>, vector<16x1xi32>
    %1 = tpu.iota {dimensions = array<i32: 1>} : vector<16x50xi32>
    %2 = vector.broadcast %0 : vector<16x1xi32> to vector<16x50xi32>
    %3 = arith.cmpi eq, %1, %2 : vector<16x50xi32>
    %4 = arith.extui %3 : vector<16x50xi1> to vector<16x50xi32>
    %5 = arith.sitofp %4 : vector<16x50xi32> to vector<16x50xf32>
    %c0_1 = arith.constant 0 : index
    %c0_2 = arith.constant 0 : index
    %6 = vector.load %arg2[%c0_1, %c0_2] : memref<50x16xf32, #tpu.memory_space<vmem>>, vector<50x16xf32>
    %cst = arith.constant dense<0.000000e+00> : vector<16x16xf32>
    %7 = tpu.matmul %5, %6, %cst {dimension_numbers = #tpu.dot_dimension_numbers<[1], [0], [0], [1], [0, 0, 1, 1], [], []>} : vector<16x50xf32>, vector<50x16xf32>, vector<16x16xf32> -> vector<16x16xf32>
    %8 = tpu.iota {dimensions = array<i32: 1>} : vector<2x128xi32>
    %c64_i32 = arith.constant 64 : i32
    %9 = vector.broadcast %c64_i32 : i32 to vector<2x128xi32>
    %10 = arith.cmpi sge, %8, %9 : vector<2x128xi32>
    %c96_i32 = arith.constant 96 : i32
    %11 = vector.broadcast %c96_i32 : i32 to vector<2x128xi32>
    %12 = arith.cmpi slt, %8, %11 : vector<2x128xi32>
    %13 = arith.andi %10, %12 : vector<2x128xi1>
    %c0_3 = arith.constant 0 : index
    %c0_4 = arith.constant 0 : index
    %14 = vector.load %arg3[%c0_3, %c0_4] : memref<16x128xf32, #tpu.memory_space<vmem>>, vector<16x128xf32>
    %c0_5 = arith.constant 0 : index
    %c0_6 = arith.constant 0 : index
    %15 = vector.load %arg4[%c0_5, %c0_6] : memref<32x128xf32, #tpu.memory_space<vmem>>, vector<32x128xf32>
    %c0_7 = arith.constant 0 : index
    %c0_8 = arith.constant 0 : index
    %16 = vector.load %arg5[%c0_7, %c0_8] : memref<1x128xf32, #tpu.memory_space<vmem>>, vector<1x128xf32>
    %cst_9 = arith.constant dense<0.000000e+00> : vector<16x128xf32>
    %17 = tpu.matmul %7, %14, %cst_9 {dimension_numbers = #tpu.dot_dimension_numbers<[1], [0], [0], [1], [0, 0, 1, 1], [], []>} : vector<16x16xf32>, vector<16x128xf32>, vector<16x128xf32> -> vector<16x128xf32>
    %18 = vector.broadcast %16 : vector<1x128xf32> to vector<16x128xf32>
    %19 = arith.addf %17, %18 : vector<16x128xf32>
    %cst_10 = arith.constant 0.000000e+00 : f32
    %20 = vector.broadcast %cst_10 : f32 to vector<2x32xf32>
    %cst_11 = arith.constant 0.000000e+00 : f32
    %21 = vector.broadcast %cst_11 : f32 to vector<2x32xf32>
    %22 = vector.extract_strided_slice %19 {offsets = [0, 0], sizes = [2, 128], strides = [1, 1]} : vector<16x128xf32> to vector<2x128xf32>
    %cst_12 = arith.constant dense<0.000000e+00> : vector<2x128xf32>
    %23 = tpu.matmul %20, %15, %cst_12 {dimension_numbers = #tpu.dot_dimension_numbers<[1], [0], [0], [1], [0, 0, 1, 1], [], []>} : vector<2x32xf32>, vector<32x128xf32>, vector<2x128xf32> -> vector<2x128xf32>
    %24 = arith.addf %22, %23 : vector<2x128xf32>
    %25 = math.tanh %24 : vector<2x128xf32>
    %26 = arith.negf %24 : vector<2x128xf32>
    %27 = math.exp %26 : vector<2x128xf32>
    %cst_13 = arith.constant 1.000000e+00 : f32
    %28 = vector.broadcast %cst_13 : f32 to vector<2x128xf32>
    %29 = arith.addf %28, %27 : vector<2x128xf32>
    %30 = arith.divf %28, %29 : vector<2x128xf32>
    %31 = arith.select %13, %25, %30 : vector<2x128xi1>, vector<2x128xf32>
    %32 = vector.extract_strided_slice %31 {offsets = [0, 0], sizes = [2, 32], strides = [1, 1]} : vector<2x128xf32> to vector<2x32xf32>
    %33 = vector.extract_strided_slice %31 {offsets = [0, 32], sizes = [2, 32], strides = [1, 1]} : vector<2x128xf32> to vector<2x32xf32>
    %34 = vector.extract_strided_slice %31 {offsets = [0, 64], sizes = [2, 32], strides = [1, 1]} : vector<2x128xf32> to vector<2x32xf32>
    %35 = vector.extract_strided_slice %31 {offsets = [0, 96], sizes = [2, 32], strides = [1, 1]} : vector<2x128xf32> to vector<2x32xf32>
    %36 = arith.mulf %33, %21 : vector<2x32xf32>
    %37 = arith.mulf %32, %34 : vector<2x32xf32>
    %38 = arith.addf %36, %37 : vector<2x32xf32>
    %39 = math.tanh %38 : vector<2x32xf32>
    %40 = arith.mulf %35, %39 : vector<2x32xf32>
    %41 = vector.extract_strided_slice %19 {offsets = [2, 0], sizes = [2, 128], strides = [1, 1]} : vector<16x128xf32> to vector<2x128xf32>
    %cst_14 = arith.constant dense<0.000000e+00> : vector<2x128xf32>
    %42 = tpu.matmul %40, %15, %cst_14 {dimension_numbers = #tpu.dot_dimension_numbers<[1], [0], [0], [1], [0, 0, 1, 1], [], []>} : vector<2x32xf32>, vector<32x128xf32>, vector<2x128xf32> -> vector<2x128xf32>
    %43 = arith.addf %41, %42 : vector<2x128xf32>
    %44 = math.tanh %43 : vector<2x128xf32>
    %45 = arith.negf %43 : vector<2x128xf32>
    %46 = math.exp %45 : vector<2x128xf32>
    %cst_15 = arith.constant 1.000000e+00 : f32
    %47 = vector.broadcast %cst_15 : f32 to vector<2x128xf32>
    %48 = arith.addf %47, %46 : vector<2x128xf32>
    %49 = arith.divf %47, %48 : vector<2x128xf32>
    %50 = arith.select %13, %44, %49 : vector<2x128xi1>, vector<2x128xf32>
    %51 = vector.extract_strided_slice %50 {offsets = [0, 0], sizes = [2, 32], strides = [1, 1]} : vector<2x128xf32> to vector<2x32xf32>
    %52 = vector.extract_strided_slice %50 {offsets = [0, 32], sizes = [2, 32], strides = [1, 1]} : vector<2x128xf32> to vector<2x32xf32>
    %53 = vector.extract_strided_slice %50 {offsets = [0, 64], sizes = [2, 32], strides = [1, 1]} : vector<2x128xf32> to vector<2x32xf32>
    %54 = vector.extract_strided_slice %50 {offsets = [0, 96], sizes = [2, 32], strides = [1, 1]} : vector<2x128xf32> to vector<2x32xf32>
    %55 = arith.mulf %52, %38 : vector<2x32xf32>
    %56 = arith.mulf %51, %53 : vector<2x32xf32>
    %57 = arith.addf %55, %56 : vector<2x32xf32>
    %58 = math.tanh %57 : vector<2x32xf32>
    %59 = arith.mulf %54, %58 : vector<2x32xf32>
    %60 = vector.extract_strided_slice %19 {offsets = [4, 0], sizes = [2, 128], strides = [1, 1]} : vector<16x128xf32> to vector<2x128xf32>
    %cst_16 = arith.constant dense<0.000000e+00> : vector<2x128xf32>
    %61 = tpu.matmul %59, %15, %cst_16 {dimension_numbers = #tpu.dot_dimension_numbers<[1], [0], [0], [1], [0, 0, 1, 1], [], []>} : vector<2x32xf32>, vector<32x128xf32>, vector<2x128xf32> -> vector<2x128xf32>
    %62 = arith.addf %60, %61 : vector<2x128xf32>
    %63 = math.tanh %62 : vector<2x128xf32>
    %64 = arith.negf %62 : vector<2x128xf32>
    %65 = math.exp %64 : vector<2x128xf32>
    %cst_17 = arith.constant 1.000000e+00 : f32
    %66 = vector.broadcast %cst_17 : f32 to vector<2x128xf32>
    %67 = arith.addf %66, %65 : vector<2x128xf32>
    %68 = arith.divf %66, %67 : vector<2x128xf32>
    %69 = arith.select %13, %63, %68 : vector<2x128xi1>, vector<2x128xf32>
    %70 = vector.extract_strided_slice %69 {offsets = [0, 0], sizes = [2, 32], strides = [1, 1]} : vector<2x128xf32> to vector<2x32xf32>
    %71 = vector.extract_strided_slice %69 {offsets = [0, 32], sizes = [2, 32], strides = [1, 1]} : vector<2x128xf32> to vector<2x32xf32>
    %72 = vector.extract_strided_slice %69 {offsets = [0, 64], sizes = [2, 32], strides = [1, 1]} : vector<2x128xf32> to vector<2x32xf32>
    %73 = vector.extract_strided_slice %69 {offsets = [0, 96], sizes = [2, 32], strides = [1, 1]} : vector<2x128xf32> to vector<2x32xf32>
    %74 = arith.mulf %71, %57 : vector<2x32xf32>
    %75 = arith.mulf %70, %72 : vector<2x32xf32>
    %76 = arith.addf %74, %75 : vector<2x32xf32>
    %77 = math.tanh %76 : vector<2x32xf32>
    %78 = arith.mulf %73, %77 : vector<2x32xf32>
    %79 = vector.extract_strided_slice %19 {offsets = [6, 0], sizes = [2, 128], strides = [1, 1]} : vector<16x128xf32> to vector<2x128xf32>
    %cst_18 = arith.constant dense<0.000000e+00> : vector<2x128xf32>
    %80 = tpu.matmul %78, %15, %cst_18 {dimension_numbers = #tpu.dot_dimension_numbers<[1], [0], [0], [1], [0, 0, 1, 1], [], []>} : vector<2x32xf32>, vector<32x128xf32>, vector<2x128xf32> -> vector<2x128xf32>
    %81 = arith.addf %79, %80 : vector<2x128xf32>
    %82 = math.tanh %81 : vector<2x128xf32>
    %83 = arith.negf %81 : vector<2x128xf32>
    %84 = math.exp %83 : vector<2x128xf32>
    %cst_19 = arith.constant 1.000000e+00 : f32
    %85 = vector.broadcast %cst_19 : f32 to vector<2x128xf32>
    %86 = arith.addf %85, %84 : vector<2x128xf32>
    %87 = arith.divf %85, %86 : vector<2x128xf32>
    %88 = arith.select %13, %82, %87 : vector<2x128xi1>, vector<2x128xf32>
    %89 = vector.extract_strided_slice %88 {offsets = [0, 0], sizes = [2, 32], strides = [1, 1]} : vector<2x128xf32> to vector<2x32xf32>
    %90 = vector.extract_strided_slice %88 {offsets = [0, 32], sizes = [2, 32], strides = [1, 1]} : vector<2x128xf32> to vector<2x32xf32>
    %91 = vector.extract_strided_slice %88 {offsets = [0, 64], sizes = [2, 32], strides = [1, 1]} : vector<2x128xf32> to vector<2x32xf32>
    %92 = vector.extract_strided_slice %88 {offsets = [0, 96], sizes = [2, 32], strides = [1, 1]} : vector<2x128xf32> to vector<2x32xf32>
    %93 = arith.mulf %90, %76 : vector<2x32xf32>
    %94 = arith.mulf %89, %91 : vector<2x32xf32>
    %95 = arith.addf %93, %94 : vector<2x32xf32>
    %96 = math.tanh %95 : vector<2x32xf32>
    %97 = arith.mulf %92, %96 : vector<2x32xf32>
    %98 = vector.extract_strided_slice %19 {offsets = [8, 0], sizes = [2, 128], strides = [1, 1]} : vector<16x128xf32> to vector<2x128xf32>
    %cst_20 = arith.constant dense<0.000000e+00> : vector<2x128xf32>
    %99 = tpu.matmul %97, %15, %cst_20 {dimension_numbers = #tpu.dot_dimension_numbers<[1], [0], [0], [1], [0, 0, 1, 1], [], []>} : vector<2x32xf32>, vector<32x128xf32>, vector<2x128xf32> -> vector<2x128xf32>
    %100 = arith.addf %98, %99 : vector<2x128xf32>
    %101 = math.tanh %100 : vector<2x128xf32>
    %102 = arith.negf %100 : vector<2x128xf32>
    %103 = math.exp %102 : vector<2x128xf32>
    %cst_21 = arith.constant 1.000000e+00 : f32
    %104 = vector.broadcast %cst_21 : f32 to vector<2x128xf32>
    %105 = arith.addf %104, %103 : vector<2x128xf32>
    %106 = arith.divf %104, %105 : vector<2x128xf32>
    %107 = arith.select %13, %101, %106 : vector<2x128xi1>, vector<2x128xf32>
    %108 = vector.extract_strided_slice %107 {offsets = [0, 0], sizes = [2, 32], strides = [1, 1]} : vector<2x128xf32> to vector<2x32xf32>
    %109 = vector.extract_strided_slice %107 {offsets = [0, 32], sizes = [2, 32], strides = [1, 1]} : vector<2x128xf32> to vector<2x32xf32>
    %110 = vector.extract_strided_slice %107 {offsets = [0, 64], sizes = [2, 32], strides = [1, 1]} : vector<2x128xf32> to vector<2x32xf32>
    %111 = vector.extract_strided_slice %107 {offsets = [0, 96], sizes = [2, 32], strides = [1, 1]} : vector<2x128xf32> to vector<2x32xf32>
    %112 = arith.mulf %109, %95 : vector<2x32xf32>
    %113 = arith.mulf %108, %110 : vector<2x32xf32>
    %114 = arith.addf %112, %113 : vector<2x32xf32>
    %115 = math.tanh %114 : vector<2x32xf32>
    %116 = arith.mulf %111, %115 : vector<2x32xf32>
    %117 = vector.extract_strided_slice %19 {offsets = [10, 0], sizes = [2, 128], strides = [1, 1]} : vector<16x128xf32> to vector<2x128xf32>
    %cst_22 = arith.constant dense<0.000000e+00> : vector<2x128xf32>
    %118 = tpu.matmul %116, %15, %cst_22 {dimension_numbers = #tpu.dot_dimension_numbers<[1], [0], [0], [1], [0, 0, 1, 1], [], []>} : vector<2x32xf32>, vector<32x128xf32>, vector<2x128xf32> -> vector<2x128xf32>
    %119 = arith.addf %117, %118 : vector<2x128xf32>
    %120 = math.tanh %119 : vector<2x128xf32>
    %121 = arith.negf %119 : vector<2x128xf32>
    %122 = math.exp %121 : vector<2x128xf32>
    %cst_23 = arith.constant 1.000000e+00 : f32
    %123 = vector.broadcast %cst_23 : f32 to vector<2x128xf32>
    %124 = arith.addf %123, %122 : vector<2x128xf32>
    %125 = arith.divf %123, %124 : vector<2x128xf32>
    %126 = arith.select %13, %120, %125 : vector<2x128xi1>, vector<2x128xf32>
    %127 = vector.extract_strided_slice %126 {offsets = [0, 0], sizes = [2, 32], strides = [1, 1]} : vector<2x128xf32> to vector<2x32xf32>
    %128 = vector.extract_strided_slice %126 {offsets = [0, 32], sizes = [2, 32], strides = [1, 1]} : vector<2x128xf32> to vector<2x32xf32>
    %129 = vector.extract_strided_slice %126 {offsets = [0, 64], sizes = [2, 32], strides = [1, 1]} : vector<2x128xf32> to vector<2x32xf32>
    %130 = vector.extract_strided_slice %126 {offsets = [0, 96], sizes = [2, 32], strides = [1, 1]} : vector<2x128xf32> to vector<2x32xf32>
    %131 = arith.mulf %128, %114 : vector<2x32xf32>
    %132 = arith.mulf %127, %129 : vector<2x32xf32>
    %133 = arith.addf %131, %132 : vector<2x32xf32>
    %134 = math.tanh %133 : vector<2x32xf32>
    %135 = arith.mulf %130, %134 : vector<2x32xf32>
    %136 = vector.extract_strided_slice %19 {offsets = [12, 0], sizes = [2, 128], strides = [1, 1]} : vector<16x128xf32> to vector<2x128xf32>
    %cst_24 = arith.constant dense<0.000000e+00> : vector<2x128xf32>
    %137 = tpu.matmul %135, %15, %cst_24 {dimension_numbers = #tpu.dot_dimension_numbers<[1], [0], [0], [1], [0, 0, 1, 1], [], []>} : vector<2x32xf32>, vector<32x128xf32>, vector<2x128xf32> -> vector<2x128xf32>
    %138 = arith.addf %136, %137 : vector<2x128xf32>
    %139 = math.tanh %138 : vector<2x128xf32>
    %140 = arith.negf %138 : vector<2x128xf32>
    %141 = math.exp %140 : vector<2x128xf32>
    %cst_25 = arith.constant 1.000000e+00 : f32
    %142 = vector.broadcast %cst_25 : f32 to vector<2x128xf32>
    %143 = arith.addf %142, %141 : vector<2x128xf32>
    %144 = arith.divf %142, %143 : vector<2x128xf32>
    %145 = arith.select %13, %139, %144 : vector<2x128xi1>, vector<2x128xf32>
    %146 = vector.extract_strided_slice %145 {offsets = [0, 0], sizes = [2, 32], strides = [1, 1]} : vector<2x128xf32> to vector<2x32xf32>
    %147 = vector.extract_strided_slice %145 {offsets = [0, 32], sizes = [2, 32], strides = [1, 1]} : vector<2x128xf32> to vector<2x32xf32>
    %148 = vector.extract_strided_slice %145 {offsets = [0, 64], sizes = [2, 32], strides = [1, 1]} : vector<2x128xf32> to vector<2x32xf32>
    %149 = vector.extract_strided_slice %145 {offsets = [0, 96], sizes = [2, 32], strides = [1, 1]} : vector<2x128xf32> to vector<2x32xf32>
    %150 = arith.mulf %147, %133 : vector<2x32xf32>
    %151 = arith.mulf %146, %148 : vector<2x32xf32>
    %152 = arith.addf %150, %151 : vector<2x32xf32>
    %153 = math.tanh %152 : vector<2x32xf32>
    %154 = arith.mulf %149, %153 : vector<2x32xf32>
    %155 = vector.extract_strided_slice %19 {offsets = [14, 0], sizes = [2, 128], strides = [1, 1]} : vector<16x128xf32> to vector<2x128xf32>
    %cst_26 = arith.constant dense<0.000000e+00> : vector<2x128xf32>
    %156 = tpu.matmul %154, %15, %cst_26 {dimension_numbers = #tpu.dot_dimension_numbers<[1], [0], [0], [1], [0, 0, 1, 1], [], []>} : vector<2x32xf32>, vector<32x128xf32>, vector<2x128xf32> -> vector<2x128xf32>
    %157 = arith.addf %155, %156 : vector<2x128xf32>
    %158 = math.tanh %157 : vector<2x128xf32>
    %159 = arith.negf %157 : vector<2x128xf32>
    %160 = math.exp %159 : vector<2x128xf32>
    %cst_27 = arith.constant 1.000000e+00 : f32
    %161 = vector.broadcast %cst_27 : f32 to vector<2x128xf32>
    %162 = arith.addf %161, %160 : vector<2x128xf32>
    %163 = arith.divf %161, %162 : vector<2x128xf32>
    %164 = arith.select %13, %158, %163 : vector<2x128xi1>, vector<2x128xf32>
    %165 = vector.extract_strided_slice %164 {offsets = [0, 0], sizes = [2, 32], strides = [1, 1]} : vector<2x128xf32> to vector<2x32xf32>
    %166 = vector.extract_strided_slice %164 {offsets = [0, 32], sizes = [2, 32], strides = [1, 1]} : vector<2x128xf32> to vector<2x32xf32>
    %167 = vector.extract_strided_slice %164 {offsets = [0, 64], sizes = [2, 32], strides = [1, 1]} : vector<2x128xf32> to vector<2x32xf32>
    %168 = vector.extract_strided_slice %164 {offsets = [0, 96], sizes = [2, 32], strides = [1, 1]} : vector<2x128xf32> to vector<2x32xf32>
    %169 = arith.mulf %166, %152 : vector<2x32xf32>
    %170 = arith.mulf %165, %167 : vector<2x32xf32>
    %171 = arith.addf %169, %170 : vector<2x32xf32>
    %172 = math.tanh %171 : vector<2x32xf32>
    %173 = arith.mulf %168, %172 : vector<2x32xf32>
    %174 = tpu.concatenate %40, %59, %78, %97, %116, %135, %154, %173 in 0 : vector<2x32xf32>, vector<2x32xf32>, vector<2x32xf32>, vector<2x32xf32>, vector<2x32xf32>, vector<2x32xf32>, vector<2x32xf32>, vector<2x32xf32> -> vector<16x32xf32>
    %c0_28 = arith.constant 0 : index
    %c0_29 = arith.constant 0 : index
    %175 = vector.load %arg6[%c0_28, %c0_29] : memref<32x128xf32, #tpu.memory_space<vmem>>, vector<32x128xf32>
    %c0_30 = arith.constant 0 : index
    %c0_31 = arith.constant 0 : index
    %176 = vector.load %arg7[%c0_30, %c0_31] : memref<32x128xf32, #tpu.memory_space<vmem>>, vector<32x128xf32>
    %c0_32 = arith.constant 0 : index
    %c0_33 = arith.constant 0 : index
    %177 = vector.load %arg8[%c0_32, %c0_33] : memref<1x128xf32, #tpu.memory_space<vmem>>, vector<1x128xf32>
    %cst_34 = arith.constant dense<0.000000e+00> : vector<16x128xf32>
    %178 = tpu.matmul %174, %175, %cst_34 {dimension_numbers = #tpu.dot_dimension_numbers<[1], [0], [0], [1], [0, 0, 1, 1], [], []>} : vector<16x32xf32>, vector<32x128xf32>, vector<16x128xf32> -> vector<16x128xf32>
    %179 = vector.broadcast %177 : vector<1x128xf32> to vector<16x128xf32>
    %180 = arith.addf %178, %179 : vector<16x128xf32>
    %cst_35 = arith.constant 0.000000e+00 : f32
    %181 = vector.broadcast %cst_35 : f32 to vector<2x32xf32>
    %cst_36 = arith.constant 0.000000e+00 : f32
    %182 = vector.broadcast %cst_36 : f32 to vector<2x32xf32>
    %183 = vector.extract_strided_slice %180 {offsets = [0, 0], sizes = [2, 128], strides = [1, 1]} : vector<16x128xf32> to vector<2x128xf32>
    %cst_37 = arith.constant dense<0.000000e+00> : vector<2x128xf32>
    %184 = tpu.matmul %181, %176, %cst_37 {dimension_numbers = #tpu.dot_dimension_numbers<[1], [0], [0], [1], [0, 0, 1, 1], [], []>} : vector<2x32xf32>, vector<32x128xf32>, vector<2x128xf32> -> vector<2x128xf32>
    %185 = arith.addf %183, %184 : vector<2x128xf32>
    %186 = math.tanh %185 : vector<2x128xf32>
    %187 = arith.negf %185 : vector<2x128xf32>
    %188 = math.exp %187 : vector<2x128xf32>
    %cst_38 = arith.constant 1.000000e+00 : f32
    %189 = vector.broadcast %cst_38 : f32 to vector<2x128xf32>
    %190 = arith.addf %189, %188 : vector<2x128xf32>
    %191 = arith.divf %189, %190 : vector<2x128xf32>
    %192 = arith.select %13, %186, %191 : vector<2x128xi1>, vector<2x128xf32>
    %193 = vector.extract_strided_slice %192 {offsets = [0, 0], sizes = [2, 32], strides = [1, 1]} : vector<2x128xf32> to vector<2x32xf32>
    %194 = vector.extract_strided_slice %192 {offsets = [0, 32], sizes = [2, 32], strides = [1, 1]} : vector<2x128xf32> to vector<2x32xf32>
    %195 = vector.extract_strided_slice %192 {offsets = [0, 64], sizes = [2, 32], strides = [1, 1]} : vector<2x128xf32> to vector<2x32xf32>
    %196 = vector.extract_strided_slice %192 {offsets = [0, 96], sizes = [2, 32], strides = [1, 1]} : vector<2x128xf32> to vector<2x32xf32>
    %197 = arith.mulf %194, %182 : vector<2x32xf32>
    %198 = arith.mulf %193, %195 : vector<2x32xf32>
    %199 = arith.addf %197, %198 : vector<2x32xf32>
    %200 = math.tanh %199 : vector<2x32xf32>
    %201 = arith.mulf %196, %200 : vector<2x32xf32>
    %202 = vector.extract_strided_slice %180 {offsets = [2, 0], sizes = [2, 128], strides = [1, 1]} : vector<16x128xf32> to vector<2x128xf32>
    %cst_39 = arith.constant dense<0.000000e+00> : vector<2x128xf32>
    %203 = tpu.matmul %201, %176, %cst_39 {dimension_numbers = #tpu.dot_dimension_numbers<[1], [0], [0], [1], [0, 0, 1, 1], [], []>} : vector<2x32xf32>, vector<32x128xf32>, vector<2x128xf32> -> vector<2x128xf32>
    %204 = arith.addf %202, %203 : vector<2x128xf32>
    %205 = math.tanh %204 : vector<2x128xf32>
    %206 = arith.negf %204 : vector<2x128xf32>
    %207 = math.exp %206 : vector<2x128xf32>
    %cst_40 = arith.constant 1.000000e+00 : f32
    %208 = vector.broadcast %cst_40 : f32 to vector<2x128xf32>
    %209 = arith.addf %208, %207 : vector<2x128xf32>
    %210 = arith.divf %208, %209 : vector<2x128xf32>
    %211 = arith.select %13, %205, %210 : vector<2x128xi1>, vector<2x128xf32>
    %212 = vector.extract_strided_slice %211 {offsets = [0, 0], sizes = [2, 32], strides = [1, 1]} : vector<2x128xf32> to vector<2x32xf32>
    %213 = vector.extract_strided_slice %211 {offsets = [0, 32], sizes = [2, 32], strides = [1, 1]} : vector<2x128xf32> to vector<2x32xf32>
    %214 = vector.extract_strided_slice %211 {offsets = [0, 64], sizes = [2, 32], strides = [1, 1]} : vector<2x128xf32> to vector<2x32xf32>
    %215 = vector.extract_strided_slice %211 {offsets = [0, 96], sizes = [2, 32], strides = [1, 1]} : vector<2x128xf32> to vector<2x32xf32>
    %216 = arith.mulf %213, %199 : vector<2x32xf32>
    %217 = arith.mulf %212, %214 : vector<2x32xf32>
    %218 = arith.addf %216, %217 : vector<2x32xf32>
    %219 = math.tanh %218 : vector<2x32xf32>
    %220 = arith.mulf %215, %219 : vector<2x32xf32>
    %221 = vector.extract_strided_slice %180 {offsets = [4, 0], sizes = [2, 128], strides = [1, 1]} : vector<16x128xf32> to vector<2x128xf32>
    %cst_41 = arith.constant dense<0.000000e+00> : vector<2x128xf32>
    %222 = tpu.matmul %220, %176, %cst_41 {dimension_numbers = #tpu.dot_dimension_numbers<[1], [0], [0], [1], [0, 0, 1, 1], [], []>} : vector<2x32xf32>, vector<32x128xf32>, vector<2x128xf32> -> vector<2x128xf32>
    %223 = arith.addf %221, %222 : vector<2x128xf32>
    %224 = math.tanh %223 : vector<2x128xf32>
    %225 = arith.negf %223 : vector<2x128xf32>
    %226 = math.exp %225 : vector<2x128xf32>
    %cst_42 = arith.constant 1.000000e+00 : f32
    %227 = vector.broadcast %cst_42 : f32 to vector<2x128xf32>
    %228 = arith.addf %227, %226 : vector<2x128xf32>
    %229 = arith.divf %227, %228 : vector<2x128xf32>
    %230 = arith.select %13, %224, %229 : vector<2x128xi1>, vector<2x128xf32>
    %231 = vector.extract_strided_slice %230 {offsets = [0, 0], sizes = [2, 32], strides = [1, 1]} : vector<2x128xf32> to vector<2x32xf32>
    %232 = vector.extract_strided_slice %230 {offsets = [0, 32], sizes = [2, 32], strides = [1, 1]} : vector<2x128xf32> to vector<2x32xf32>
    %233 = vector.extract_strided_slice %230 {offsets = [0, 64], sizes = [2, 32], strides = [1, 1]} : vector<2x128xf32> to vector<2x32xf32>
    %234 = vector.extract_strided_slice %230 {offsets = [0, 96], sizes = [2, 32], strides = [1, 1]} : vector<2x128xf32> to vector<2x32xf32>
    %235 = arith.mulf %232, %218 : vector<2x32xf32>
    %236 = arith.mulf %231, %233 : vector<2x32xf32>
    %237 = arith.addf %235, %236 : vector<2x32xf32>
    %238 = math.tanh %237 : vector<2x32xf32>
    %239 = arith.mulf %234, %238 : vector<2x32xf32>
    %240 = vector.extract_strided_slice %180 {offsets = [6, 0], sizes = [2, 128], strides = [1, 1]} : vector<16x128xf32> to vector<2x128xf32>
    %cst_43 = arith.constant dense<0.000000e+00> : vector<2x128xf32>
    %241 = tpu.matmul %239, %176, %cst_43 {dimension_numbers = #tpu.dot_dimension_numbers<[1], [0], [0], [1], [0, 0, 1, 1], [], []>} : vector<2x32xf32>, vector<32x128xf32>, vector<2x128xf32> -> vector<2x128xf32>
    %242 = arith.addf %240, %241 : vector<2x128xf32>
    %243 = math.tanh %242 : vector<2x128xf32>
    %244 = arith.negf %242 : vector<2x128xf32>
    %245 = math.exp %244 : vector<2x128xf32>
    %cst_44 = arith.constant 1.000000e+00 : f32
    %246 = vector.broadcast %cst_44 : f32 to vector<2x128xf32>
    %247 = arith.addf %246, %245 : vector<2x128xf32>
    %248 = arith.divf %246, %247 : vector<2x128xf32>
    %249 = arith.select %13, %243, %248 : vector<2x128xi1>, vector<2x128xf32>
    %250 = vector.extract_strided_slice %249 {offsets = [0, 0], sizes = [2, 32], strides = [1, 1]} : vector<2x128xf32> to vector<2x32xf32>
    %251 = vector.extract_strided_slice %249 {offsets = [0, 32], sizes = [2, 32], strides = [1, 1]} : vector<2x128xf32> to vector<2x32xf32>
    %252 = vector.extract_strided_slice %249 {offsets = [0, 64], sizes = [2, 32], strides = [1, 1]} : vector<2x128xf32> to vector<2x32xf32>
    %253 = vector.extract_strided_slice %249 {offsets = [0, 96], sizes = [2, 32], strides = [1, 1]} : vector<2x128xf32> to vector<2x32xf32>
    %254 = arith.mulf %251, %237 : vector<2x32xf32>
    %255 = arith.mulf %250, %252 : vector<2x32xf32>
    %256 = arith.addf %254, %255 : vector<2x32xf32>
    %257 = math.tanh %256 : vector<2x32xf32>
    %258 = arith.mulf %253, %257 : vector<2x32xf32>
    %259 = vector.extract_strided_slice %180 {offsets = [8, 0], sizes = [2, 128], strides = [1, 1]} : vector<16x128xf32> to vector<2x128xf32>
    %cst_45 = arith.constant dense<0.000000e+00> : vector<2x128xf32>
    %260 = tpu.matmul %258, %176, %cst_45 {dimension_numbers = #tpu.dot_dimension_numbers<[1], [0], [0], [1], [0, 0, 1, 1], [], []>} : vector<2x32xf32>, vector<32x128xf32>, vector<2x128xf32> -> vector<2x128xf32>
    %261 = arith.addf %259, %260 : vector<2x128xf32>
    %262 = math.tanh %261 : vector<2x128xf32>
    %263 = arith.negf %261 : vector<2x128xf32>
    %264 = math.exp %263 : vector<2x128xf32>
    %cst_46 = arith.constant 1.000000e+00 : f32
    %265 = vector.broadcast %cst_46 : f32 to vector<2x128xf32>
    %266 = arith.addf %265, %264 : vector<2x128xf32>
    %267 = arith.divf %265, %266 : vector<2x128xf32>
    %268 = arith.select %13, %262, %267 : vector<2x128xi1>, vector<2x128xf32>
    %269 = vector.extract_strided_slice %268 {offsets = [0, 0], sizes = [2, 32], strides = [1, 1]} : vector<2x128xf32> to vector<2x32xf32>
    %270 = vector.extract_strided_slice %268 {offsets = [0, 32], sizes = [2, 32], strides = [1, 1]} : vector<2x128xf32> to vector<2x32xf32>
    %271 = vector.extract_strided_slice %268 {offsets = [0, 64], sizes = [2, 32], strides = [1, 1]} : vector<2x128xf32> to vector<2x32xf32>
    %272 = vector.extract_strided_slice %268 {offsets = [0, 96], sizes = [2, 32], strides = [1, 1]} : vector<2x128xf32> to vector<2x32xf32>
    %273 = arith.mulf %270, %256 : vector<2x32xf32>
    %274 = arith.mulf %269, %271 : vector<2x32xf32>
    %275 = arith.addf %273, %274 : vector<2x32xf32>
    %276 = math.tanh %275 : vector<2x32xf32>
    %277 = arith.mulf %272, %276 : vector<2x32xf32>
    %278 = vector.extract_strided_slice %180 {offsets = [10, 0], sizes = [2, 128], strides = [1, 1]} : vector<16x128xf32> to vector<2x128xf32>
    %cst_47 = arith.constant dense<0.000000e+00> : vector<2x128xf32>
    %279 = tpu.matmul %277, %176, %cst_47 {dimension_numbers = #tpu.dot_dimension_numbers<[1], [0], [0], [1], [0, 0, 1, 1], [], []>} : vector<2x32xf32>, vector<32x128xf32>, vector<2x128xf32> -> vector<2x128xf32>
    %280 = arith.addf %278, %279 : vector<2x128xf32>
    %281 = math.tanh %280 : vector<2x128xf32>
    %282 = arith.negf %280 : vector<2x128xf32>
    %283 = math.exp %282 : vector<2x128xf32>
    %cst_48 = arith.constant 1.000000e+00 : f32
    %284 = vector.broadcast %cst_48 : f32 to vector<2x128xf32>
    %285 = arith.addf %284, %283 : vector<2x128xf32>
    %286 = arith.divf %284, %285 : vector<2x128xf32>
    %287 = arith.select %13, %281, %286 : vector<2x128xi1>, vector<2x128xf32>
    %288 = vector.extract_strided_slice %287 {offsets = [0, 0], sizes = [2, 32], strides = [1, 1]} : vector<2x128xf32> to vector<2x32xf32>
    %289 = vector.extract_strided_slice %287 {offsets = [0, 32], sizes = [2, 32], strides = [1, 1]} : vector<2x128xf32> to vector<2x32xf32>
    %290 = vector.extract_strided_slice %287 {offsets = [0, 64], sizes = [2, 32], strides = [1, 1]} : vector<2x128xf32> to vector<2x32xf32>
    %291 = vector.extract_strided_slice %287 {offsets = [0, 96], sizes = [2, 32], strides = [1, 1]} : vector<2x128xf32> to vector<2x32xf32>
    %292 = arith.mulf %289, %275 : vector<2x32xf32>
    %293 = arith.mulf %288, %290 : vector<2x32xf32>
    %294 = arith.addf %292, %293 : vector<2x32xf32>
    %295 = math.tanh %294 : vector<2x32xf32>
    %296 = arith.mulf %291, %295 : vector<2x32xf32>
    %297 = vector.extract_strided_slice %180 {offsets = [12, 0], sizes = [2, 128], strides = [1, 1]} : vector<16x128xf32> to vector<2x128xf32>
    %cst_49 = arith.constant dense<0.000000e+00> : vector<2x128xf32>
    %298 = tpu.matmul %296, %176, %cst_49 {dimension_numbers = #tpu.dot_dimension_numbers<[1], [0], [0], [1], [0, 0, 1, 1], [], []>} : vector<2x32xf32>, vector<32x128xf32>, vector<2x128xf32> -> vector<2x128xf32>
    %299 = arith.addf %297, %298 : vector<2x128xf32>
    %300 = math.tanh %299 : vector<2x128xf32>
    %301 = arith.negf %299 : vector<2x128xf32>
    %302 = math.exp %301 : vector<2x128xf32>
    %cst_50 = arith.constant 1.000000e+00 : f32
    %303 = vector.broadcast %cst_50 : f32 to vector<2x128xf32>
    %304 = arith.addf %303, %302 : vector<2x128xf32>
    %305 = arith.divf %303, %304 : vector<2x128xf32>
    %306 = arith.select %13, %300, %305 : vector<2x128xi1>, vector<2x128xf32>
    %307 = vector.extract_strided_slice %306 {offsets = [0, 0], sizes = [2, 32], strides = [1, 1]} : vector<2x128xf32> to vector<2x32xf32>
    %308 = vector.extract_strided_slice %306 {offsets = [0, 32], sizes = [2, 32], strides = [1, 1]} : vector<2x128xf32> to vector<2x32xf32>
    %309 = vector.extract_strided_slice %306 {offsets = [0, 64], sizes = [2, 32], strides = [1, 1]} : vector<2x128xf32> to vector<2x32xf32>
    %310 = vector.extract_strided_slice %306 {offsets = [0, 96], sizes = [2, 32], strides = [1, 1]} : vector<2x128xf32> to vector<2x32xf32>
    %311 = arith.mulf %308, %294 : vector<2x32xf32>
    %312 = arith.mulf %307, %309 : vector<2x32xf32>
    %313 = arith.addf %311, %312 : vector<2x32xf32>
    %314 = math.tanh %313 : vector<2x32xf32>
    %315 = arith.mulf %310, %314 : vector<2x32xf32>
    %316 = vector.extract_strided_slice %180 {offsets = [14, 0], sizes = [2, 128], strides = [1, 1]} : vector<16x128xf32> to vector<2x128xf32>
    %cst_51 = arith.constant dense<0.000000e+00> : vector<2x128xf32>
    %317 = tpu.matmul %315, %176, %cst_51 {dimension_numbers = #tpu.dot_dimension_numbers<[1], [0], [0], [1], [0, 0, 1, 1], [], []>} : vector<2x32xf32>, vector<32x128xf32>, vector<2x128xf32> -> vector<2x128xf32>
    %318 = arith.addf %316, %317 : vector<2x128xf32>
    %319 = math.tanh %318 : vector<2x128xf32>
    %320 = arith.negf %318 : vector<2x128xf32>
    %321 = math.exp %320 : vector<2x128xf32>
    %cst_52 = arith.constant 1.000000e+00 : f32
    %322 = vector.broadcast %cst_52 : f32 to vector<2x128xf32>
    %323 = arith.addf %322, %321 : vector<2x128xf32>
    %324 = arith.divf %322, %323 : vector<2x128xf32>
    %325 = arith.select %13, %319, %324 : vector<2x128xi1>, vector<2x128xf32>
    %326 = vector.extract_strided_slice %325 {offsets = [0, 0], sizes = [2, 32], strides = [1, 1]} : vector<2x128xf32> to vector<2x32xf32>
    %327 = vector.extract_strided_slice %325 {offsets = [0, 32], sizes = [2, 32], strides = [1, 1]} : vector<2x128xf32> to vector<2x32xf32>
    %328 = vector.extract_strided_slice %325 {offsets = [0, 64], sizes = [2, 32], strides = [1, 1]} : vector<2x128xf32> to vector<2x32xf32>
    %329 = vector.extract_strided_slice %325 {offsets = [0, 96], sizes = [2, 32], strides = [1, 1]} : vector<2x128xf32> to vector<2x32xf32>
    %330 = arith.mulf %327, %313 : vector<2x32xf32>
    %331 = arith.mulf %326, %328 : vector<2x32xf32>
    %332 = arith.addf %330, %331 : vector<2x32xf32>
    %333 = math.tanh %332 : vector<2x32xf32>
    %334 = arith.mulf %329, %333 : vector<2x32xf32>
    %335 = tpu.concatenate %201, %220, %239, %258, %277, %296, %315, %334 in 0 : vector<2x32xf32>, vector<2x32xf32>, vector<2x32xf32>, vector<2x32xf32>, vector<2x32xf32>, vector<2x32xf32>, vector<2x32xf32>, vector<2x32xf32> -> vector<16x32xf32>
    %c0_53 = arith.constant 0 : index
    %c0_54 = arith.constant 0 : index
    %336 = vector.load %arg9[%c0_53, %c0_54] : memref<32x128xf32, #tpu.memory_space<vmem>>, vector<32x128xf32>
    %cst_55 = arith.constant dense<0.000000e+00> : vector<16x128xf32>
    %337 = tpu.matmul %335, %336, %cst_55 {dimension_numbers = #tpu.dot_dimension_numbers<[1], [0], [0], [1], [0, 0, 1, 1], [], []>} : vector<16x32xf32>, vector<32x128xf32>, vector<16x128xf32> -> vector<16x128xf32>
    %c0_56 = arith.constant 0 : index
    %c0_57 = arith.constant 0 : index
    %338 = vector.load %arg10[%c0_56, %c0_57] : memref<1x128xf32, #tpu.memory_space<vmem>>, vector<1x128xf32>
    %339 = vector.broadcast %338 : vector<1x128xf32> to vector<16x128xf32>
    %340 = arith.addf %337, %339 : vector<16x128xf32>
    %cst_58 = arith.constant dense<0xFF800000> : vector<16xf32>
    %341 = vector.multi_reduction <maximumf>, %340, %cst_58 [1] : vector<16x128xf32> to vector<16xf32>
    %342 = vector.shape_cast %341 : vector<16xf32> to vector<16x1xf32>
    %343 = vector.broadcast %342 : vector<16x1xf32> to vector<16x128xf32>
    %344 = arith.subf %340, %343 : vector<16x128xf32>
    %345 = math.exp %344 : vector<16x128xf32>
    %cst_59 = arith.constant dense<0.000000e+00> : vector<16xf32>
    %346 = vector.multi_reduction <add>, %345, %cst_59 [1] : vector<16x128xf32> to vector<16xf32>
    %347 = vector.shape_cast %346 : vector<16xf32> to vector<16x1xf32>
    %348 = math.log %347 : vector<16x1xf32>
    %349 = vector.broadcast %348 : vector<16x1xf32> to vector<16x128xf32>
    %350 = arith.subf %344, %349 : vector<16x128xf32>
    %c0_60 = arith.constant 0 : index
    %c0_61 = arith.constant 0 : index
    %351 = vector.load %arg11[%c0_60, %c0_61] : memref<16x128xf32, #tpu.memory_space<vmem>>, vector<16x128xf32>
    tpu.vector_store %arg11[%c0_60, %c0_61], %350 {strides = array<i32>} : memref<16x128xf32, #tpu.memory_space<vmem>>, vector<16x128xf32>,
    %c0_62 = arith.constant 0 : index
    %c0_63 = arith.constant 0 : index
    %352 = vector.load %arg1[%c0_62, %c0_63] : memref<16x1xi32, #tpu.memory_space<vmem>>, vector<16x1xi32>
    %cst_64 = arith.constant dense<0xFF800000> : vector<16xf32>
    %353 = vector.multi_reduction <maximumf>, %350, %cst_64 [1] : vector<16x128xf32> to vector<16xf32>
    %354 = vector.shape_cast %353 : vector<16xf32> to vector<16x1xf32>
    %355 = vector.broadcast %354 : vector<16x1xf32> to vector<16x128xf32>
    %356 = arith.subf %350, %355 : vector<16x128xf32>
    %357 = math.exp %356 : vector<16x128xf32>
    %cst_65 = arith.constant dense<0.000000e+00> : vector<16xf32>
    %358 = vector.multi_reduction <add>, %357, %cst_65 [1] : vector<16x128xf32> to vector<16xf32>
    %359 = vector.shape_cast %358 : vector<16xf32> to vector<16x1xf32>
    %360 = math.log %359 : vector<16x1xf32>
    %361 = vector.broadcast %360 : vector<16x1xf32> to vector<16x128xf32>
    %362 = arith.subf %356, %361 : vector<16x128xf32>
    %363 = tpu.iota {dimensions = array<i32: 1>} : vector<16x128xi32>
    %364 = vector.broadcast %352 : vector<16x1xi32> to vector<16x128xi32>
    %365 = arith.cmpi eq, %363, %364 : vector<16x128xi32>
    %cst_66 = arith.constant 0.000000e+00 : f32
    %366 = vector.broadcast %cst_66 : f32 to vector<16x128xf32>
    %367 = arith.select %365, %362, %366 : vector<16x128xi1>, vector<16x128xf32>
    %cst_67 = arith.constant dense<0.000000e+00> : vector<16xf32>
    %368 = vector.multi_reduction <add>, %367, %cst_67 [1] : vector<16x128xf32> to vector<16xf32>
    %369 = vector.shape_cast %368 : vector<16xf32> to vector<16x1xf32>
    %cst_68 = arith.constant 0.000000e+00 : f32
    %370 = vector.broadcast %cst_68 : f32 to vector<16x1xf32>
    %371 = arith.subf %370, %369 : vector<16x1xf32>
    %c9_i32 = arith.constant 9 : i32
    %372 = vector.broadcast %c9_i32 : i32 to vector<16x1xi32>
    %373 = arith.cmpi ne, %352, %372 : vector<16x1xi32>
    %374 = arith.extui %373 : vector<16x1xi1> to vector<16x1xi32>
    %375 = arith.sitofp %374 : vector<16x1xi32> to vector<16x1xf32>
    %376 = arith.mulf %371, %375 : vector<16x1xf32>
    %cst_69 = arith.constant dense<0.000000e+00> : vector<1xf32>
    %377 = vector.multi_reduction <add>, %376, %cst_69 [0] : vector<16x1xf32> to vector<1xf32>
    %378 = vector.shape_cast %377 : vector<1xf32> to vector<1x1xf32>
    %cst_70 = arith.constant dense<0.000000e+00> : vector<1xf32>
    %379 = vector.multi_reduction <add>, %375, %cst_70 [0] : vector<16x1xf32> to vector<1xf32>
    %380 = vector.shape_cast %379 : vector<1xf32> to vector<1x1xf32>
    %381 = arith.divf %378, %380 : vector<1x1xf32>
    %c0_71 = arith.constant 0 : index
    %c0_72 = arith.constant 0 : index
    %382 = vector.load %arg12[%c0_71, %c0_72] : memref<1x1xf32, #tpu.memory_space<vmem>>, vector<1x1xf32>
    tpu.vector_store %arg12[%c0_71, %c0_72], %381 {strides = array<i32>} : memref<1x1xf32, #tpu.memory_space<vmem>>, vector<1x1xf32>,
    return
  }
}

</mosaic_0001>

<bundles_post_ra>
// kernel: lstm_model_forward.1
= control target key start
LH: loop header
LB: loop body
LE: loop exit
PB: predicated region body
PF: predicated region fallthrough
CT: control target
= control target key end

     0   :  { %18 = vsyncpa [#allocation3], 0  ;;  %s3444_s0 = inlined_call_operand.vmem [shape: s32[16,1], index: 0, kind: input, shape index: {}]   ;;  %s3445_s1 = inlined_call_operand.vmem [shape: s32[16,1], index: 1, kind: input, shape index: {}]   ;;  %s3446_s2 = inlined_call_operand.vmem [shape: f32[50,16], index: 2, kind: input, shape index: {}]   ;;  %s3447_s3 = inlined_call_operand.hbm [shape: f32[16,128], index: 3, kind: input, shape index: {}]   ;;  %s3448_s4 = inlined_call_operand.vmem [shape: f32[32,128], index: 4, kind: input, shape index: {}]   ;;  %s3449_s5 = inlined_call_operand.vmem [shape: f32[1,128], index: 5, kind: input, shape index: {}]   ;;  %s3450_s6 = inlined_call_operand.vmem [shape: f32[32,128], index: 6, kind: input, shape index: {}]   ;;  %s3451_s7 = inlined_call_operand.vmem [shape: f32[32,128], index: 7, kind: input, shape index: {}]   ;;  %s3452_s8 = inlined_call_operand.vmem [shape: f32[1,128], index: 8, kind: input, shape index: {}]   ;;  %s3453_s9 = inlined_call_operand.vmem [shape: f32[32,128], index: 9, kind: input, shape index: {}]   ;;  %s3454_s10 = inlined_call_operand.hbm [shape: f32[1,128], index: 10, kind: input, shape index: {}]   ;;  %s3455_s11 = inlined_call_operand.vmem [shape: f32[16,128], index: 11, kind: output, shape index: {0}]   ;;  %s3456_s12 = inlined_call_operand.hbm [shape: f32[1,1], index: 12, kind: output, shape index: {1}]  }
   0x1   :  { %19 = vsyncpa [#allocation6], 0 }
   0x2   :  { %20 = vsyncpa [#allocation4], 0  ;;  %s2890_s21 = smov [#allocation2]  }
   0x3   :  { %s32_s22 = sshll.u32 %s2890_s21, 4  ;;  %s33_s22 = int_to_ptr.vmem [resolvable:$true] %s32_s22 }
   0x4   :  { %s2832_s23 = scalar_lea.vmem %s33_s22, 256  ;;  %p2837_p1 = scmp.lt.s32.totalorder %s33_s22, %s33_s22 }
   0x5   :  { %p2833_p0 = scmp.ne.s32.totalorder %s33_s22, %s2832_s23  ;;  %p2838_p2 = scmp.lt.s32.totalorder %s2832_s23, %s2832_s23 }
   0x7   :  { %p2839_p3 = por %p2838_p2, %p2837_p1 }
   0x9   :  { %p2840_p4 = pnand %p2839_p3, %p2833_p0 }
   0xb   :  { %2843 = shalt.err (!%p2840_p4)
}
   0xc   :  { %s2891_s24 = smov 128   ;;  %s2892_s25 = smov 8  }
   0xd   :  { %38 = dma.hbm_to_vmem [thread:$0]  %s3447_s3, 256, %s33_s22, [#allocation3], %s2891_s24, %s2891_s24, %s2892_s25  }
   0xe   :  { %s2893_s28 = smov [#allocation5]  }
   0xf   :  { %s57_s29 = sshll.u32 %s2893_s28, 4  ;;  %s58_s29 = int_to_ptr.vmem [resolvable:$true] %s57_s29 }
  0x10   :  { %s2852_s30 = scalar_lea.vmem %s58_s29, 16  ;;  %s2856_s13 = scalar_lea.vmem %s58_s29, 32 }
  0x11   :  { %p2853_p5 = scmp.ne.s32.totalorder %s58_s29, %s2852_s30  ;;  %p2857_p6 = scmp.lt.s32.totalorder %s58_s29, %s58_s29 }
  0x12   :  { %p2858_p7 = scmp.lt.s32.totalorder %s2856_s13, %s2852_s30 }
  0x14   :  { %p2859_p8 = por %p2858_p7, %p2857_p6 }
  0x16   :  { %p2860_p9 = pnand %p2859_p8, %p2853_p5 }
  0x18   :  { %2863 = shalt.err (!%p2860_p9)
}
  0x19   :  { %60 = dma.hbm_to_vmem [thread:$0]  %s3454_s10, 16, %s58_s29, [#allocation6]  }
  0x1a   :  { %2884 = dma.done.wait [#allocation3], 256  }
  0x1b   :  { %2885 = vsyncadd [#allocation3], 4294967040 }
  0x1c   :  { %2886 = dma.done.wait [#allocation6], 16  }
  0x1d   :  { %2887 = vsyncadd [#allocation6], 4294967280  ;;  %v2894_v0 = vmov 0   ;;  %vm97_vm0 = vcmask 1041408   ;;  %v2895_v1 = vmov 0.0   ;;  %v67_v2 = vld [vmem:[%s3444_s0] sm:$0xff]  ;;  %v69_v13 = vlaneseq }
  0x1e   :  { %2676 = vset.pattern.permute.xlu0 %v2894_v0  ;;  %2677 = vset.pattern.permute.xlu1 %v2894_v0  ;;  %v89_v3 = vld [vmem:[%s3446_s2 + $0x30] sm:$0x3]  ;;  %v88_v4 = vld [vmem:[%s3446_s2 + $0x28] sm:$0xff]  ;;  %v87_v6 = vld [vmem:[%s3446_s2 + $0x20] sm:$0xff]  ;;  %vm90_vm1 = vcmask 408576   ;;  %vm2896_vm4 = vmmov 0  }
  0x1f   :  { %2468 = vmatprep.subr.mxu1 %v2895_v1  ;;  %72 = vperm.xlu0 %2676, %v67_v2   ;;  %v68_v5 = vld [vmem:[%s3444_s0 + $0x8] sm:$0xff]  ;;  %v2992_v7 = vld [vmem:[%s3448_s4 + $0x18] sm:$0xff]  ;;  %v85_v9 = vld [vmem:[%s3446_s2 + $0x10] sm:$0xff]  ;;  %v3008_v14 = vand.u32 127, %v69_v13  ;;  %vm192_vm5 = vcmask 130048   ;;  %s2898_s19 = smov 32  }
  0x20   :  { %2444 = vmatprep.subr.msk.mxu0 %vm97_vm0, %v89_v3  ;;  %v86_v8 = vld [vmem:[%s3446_s2 + $0x18] sm:$0xff]  ;;  %2469 = vmatpush3.msra.mxu1 %v2992_v7  ;;  %v84_v10 = vld [vmem:[%s3446_s2 + $0x8] sm:$0xff]  ;;  %v83_v11 = vld [vmem:[%s3446_s2] sm:$0xff]  ;;  %vm274_vm9 = vcmask 261120   ;;  %vm1126_vm10 = vcmask 1043456   ;;  %vm1128_vm11 = vcmask 1045504  }
  0x21   :  { %2445 = vmatpush3.msk.msra.mxu0 %vm97_vm0, %v89_v3  ;;  %2470 = vmatprep.subr.mxu1 %v2895_v1  ;;  %v180_v12 = vld [vmem:[#allocation2 + $0x8] sm:$0xff]  ;;  %v179_v19 = vld [vmem:[#allocation2] sm:$0xff]  ;;  %v3017_v20 = vld [vmem:[%s3448_s4 + $0x10] sm:$0xff]  ;;  %vm176_vm6 = vcmp.ge.s32.totalorder %v3008_v14, 64  ;;  %vm177_vm7 = vcmp.lt.s32.totalorder %v3008_v14, 96 }
  0x22   :  { %2446 = vmatprep.subr.mxu0 %v88_v4  ;;  %2471 = vmatpush3.msra.mxu1 %v3017_v20  ;;  %v3024_v21 = vld [vmem:[%s3448_s4 + $0x8] sm:$0xff]  ;;  %v3032_v22 = vld [vmem:[%s3448_s4] sm:$0xff]  ;;  %vm3069_vm8 = vmand %vm176_vm6, %vm177_vm7 }
  0x23   :  { %2447 = vmatpush3.msra.mxu0 %v88_v4  ;;  %75 = vperm.xlu0 %2676, %v68_v5   ;;  %v2298_v27 = vld [vmem:[%s3449_s5] ss:$0 sm:$0xff]  ;;  %s2897_s5 = smov 64   ;;  %v2089_v36 = vld [vmem:[%s3453_s9 + $0x18] sm:$0xff] }
  0x24   :  { %2448 = vmatprep.subr.mxu0 %v87_v6  ;;  %2472 = vmatprep.subr.mxu1 %v2895_v1 }
  0x25   :  { %2449 = vmatpush3.msra.mxu0 %v87_v6  ;;  %2473 = vmatpush3.msra.mxu1 %v3024_v21 }
  0x26   :  { %2450 = vmatprep.subr.mxu0 %v86_v8  ;;  %2474 = vmatprep.subr.mxu1 %v2895_v1 }
  0x27   :  { %2451 = vmatpush3.msra.mxu0 %v86_v8  ;;  %2475 = vmatpush3.msra.mxu1 %v3032_v22 }
  0x28   :  { %2452 = vmatprep.subr.mxu0 %v85_v9  ;;  %2476 = vmatprep.mubr.msk.f32.mxu1 %vm2896_vm4, %v2895_v1 }
  0x29   :  { %2453 = vmatpush3.msra.mxu0 %v85_v9  ;;  %2477 = vmatmul.mubr.f32.vlgmr.msra.gmra.mxu1 %v2895_v1 }
  0x2a   :  { %2454 = vmatprep.subr.mxu0 %v84_v10  ;;  %2479 = vmatprep.subr.mxu1 %v2895_v1 }
  0x2b   :  { %2455 = vmatpush3.msra.mxu0 %v84_v10  ;;  %2480 = vmatpush3.msra.mxu1 %v2992_v7 }
  0x2c   :  { %2456 = vmatprep.subr.mxu0 %v83_v11  ;;  %2487 = vmatprep.mubr.msk.f32.mxu1 %vm2896_vm4, %v2895_v1 }
  0x2d   :  { %2457 = vmatpush3.msra.mxu0 %v83_v11  ;;  %2481 = vmatprep.subr.mxu1 %v2895_v1 }
  0x2e   :  { %2461 = vmatprep.subr.mxu0 %v180_v12  ;;  %2482 = vmatpush3.msra.mxu1 %v3017_v20 }
  0x2f   :  { %2483 = vmatprep.subr.mxu1 %v2895_v1 }
  0x30   :  { %2484 = vmatpush3.msra.mxu1 %v3024_v21 }
  0x31   :  { %2485 = vmatprep.subr.mxu1 %v2895_v1 }
  0x32   :  { %2486 = vmatpush3.msra.mxu1 %v3032_v22 }
  0x33   :  { %2501 = vmatprep.subr.mxu1 %v2895_v1 }
  0x9a   :  { %v73_v15 = vpop.permute.xlu0 %72 }
  0x9b   :  { %vm77_vm2 = vcmp.eq.s32.totalorder %v3008_v14, %v73_v15 }
  0x9c   :  { %v2293_v16 = vsel %vm77_vm2, 1.0, %v2895_v1 }
  0x9d   :  { %2458 = vmatprep.mubr.msk.f32.mxu0 %vm90_vm1, %v2293_v16 }
  0x9e   :  { %v76_v17 = vpop.permute.xlu0 %75 }
  0x9f   :  { %vm78_vm3 = vcmp.eq.s32.totalorder %v3008_v14, %v76_v17 }
  0xa0   :  { %v2294_v18 = vsel %vm78_vm3, 1.0, %v2895_v1 }
  0xa1   :  { %2459 = vmatmul.mubr.msk.f32.vlgmr.msra.gmra.mxu0 %vm90_vm1, %v2294_v18  ;;  %vm2271_vm1 = vcmask 0  }
  0xa2   :  { %2462 = vmatpush3.msra.mxu0 %v180_v12 }
  0xa3   :  { %2463 = vmatprep.subr.mxu0 %v179_v19 }
  0xa4   :  { %2464 = vmatpush3.msra.mxu0 %v179_v19 }
  0xa5   :  { %2490 = vmatprep.subr.mxu0 %v2895_v1 }
  0xe9   :  { %v344_v25 = vpop.f32.mrf.mxu1 }
  0xeb   :  { %v2478_v26 = vpop.f32.mrf.mxu1 }
 0x161   :  { %v2460_v23 = vpop.f32.mrf.mxu0 }
 0x163   :  { %v167_v24 = vpop.f32.mrf.mxu0 }
 0x164   :  { %2465 = vmatprep.mubr.msk.f32.mxu0 %vm192_vm5, %v167_v24 }
 0x165   :  { %2466 = vmatmul.mubr.msk.f32.vlgmr.msra.gmra.mxu0 %vm192_vm5, %v2460_v23 }
 0x166   :  { %2491 = vmatpush3.msra.mxu0 %v2992_v7  ;;  %2498 = vmatprep.mubr.msk.f32.mxu0 %vm2896_vm4, %v2895_v1 }
 0x167   :  { %2492 = vmatprep.subr.mxu0 %v2895_v1 }
 0x168   :  { %2493 = vmatpush3.msra.mxu0 %v3017_v20 }
 0x169   :  { %2494 = vmatprep.subr.mxu0 %v2895_v1 }
 0x16a   :  { %2495 = vmatpush3.msra.mxu0 %v3024_v21 }
 0x16b   :  { %2496 = vmatprep.subr.mxu0 %v2895_v1 }
 0x16c   :  { %2497 = vmatpush3.msra.mxu0 %v3032_v22 }
 0x16d   :  { %2512 = vmatprep.subr.mxu0 %v2895_v1 }
 0x225   :  { %v2467_v28 = vpop.f32.mrf.mxu0 }
 0x226   :  { %v3062_v29 = vadd.f32 %v2467_v28, %v2298_v27 }
 0x227   :  { %v265_v30 = vpop.f32.mrf.mxu0 }
 0x228   :  { %v3064_v31 = vadd.f32 %v2298_v27, %v265_v30 }
 0x22a   :  { %v348_v32 = vadd.f32 %v344_v25, %v3064_v31 }
 0x22c   :  { %v2301_v33 = vmul.f32 -1.442695, %v348_v32 }
 0x22e   :  { %2678 = vpow2.f32 %v2301_v33 }
 0x22f   :  { %2680 = vtanh.f32 %v348_v32 }
 0x23b   :  { %v2679_v34 = vpop.eup %2678 }
 0x23c   :  { %v353_v35 = vadd.f32 1.0, %v2679_v34  ;;  %v2681_v37 = vpop.eup %2680 }
 0x23e   :  { %2682 = vrcp.f32 %v353_v35 }
 0x24b   :  { %v2683_v38 = vpop.eup %2682 }
 0x24c   :  { %v356_v39 = vsel %vm3069_vm8, %v2681_v37, %v2683_v38 }
 0x24d   :  { %359 = vrot.lane.b32.xlu1 %v356_v39, %s2897_s5  ;;  %v357_v42 = vmul.f32 0.0, %v356_v39 }
 0x2bf   :  { %v360_v40 = vpop.permute.xlu1 %359 }
 0x2c0   :  { %v362_v41 = vmul.f32 %v360_v40, %v356_v39 }
 0x2c2   :  { %364 = vrot.lane.b32.xlu1 %v362_v41, %s2898_s19 }
 0x334   :  { %v365_v43 = vpop.permute.xlu1 %364 }
 0x335   :  { %v367_v44 = vadd.f32 %v365_v43, %v357_v42 }
 0x337   :  { %2684 = vtanh.f32 %v367_v44  ;;  %v462_v61 = vrot.slane %v367_v44, 6 }
 0x344   :  { %v2685_v45 = vpop.eup %2684 }
 0x345   :  { %370 = vrot.lane.b32.xlu0 %v2685_v45, %s2897_s5 }
 0x3b7   :  { %v371_v46 = vpop.permute.xlu0 %370 }
 0x3b8   :  { %v3078_v47 = vmul.f32 %v371_v46, %v356_v39 }
 0x3ba   :  { %375 = vrot.lane.b32.xlu1 %v3078_v47, %s2898_s19 }
 0x42c   :  { %v376_v48 = vpop.permute.xlu1 %375 }
 0x42d   :  { %2488 = vmatmul.mubr.msk.f32.vlgmr.msra.gmra.mxu1 %vm274_vm9, %v376_v48 }
 0x42e   :  { %2502 = vmatpush3.msra.mxu1 %v2992_v7  ;;  %2509 = vmatprep.mubr.msk.f32.mxu1 %vm2896_vm4, %v2895_v1 }
 0x42f   :  { %2503 = vmatprep.subr.mxu1 %v2895_v1 }
 0x430   :  { %2504 = vmatpush3.msra.mxu1 %v3017_v20 }
 0x431   :  { %2505 = vmatprep.subr.mxu1 %v2895_v1 }
 0x432   :  { %2506 = vmatpush3.msra.mxu1 %v3024_v21 }
 0x433   :  { %2507 = vmatprep.subr.mxu1 %v2895_v1 }
 0x434   :  { %2508 = vmatpush3.msra.mxu1 %v3032_v22 }
 0x435   :  { %2523 = vmatprep.subr.mxu1 %v2895_v1 }
 0x4ed   :  { %v445_v49 = vpop.f32.mrf.mxu1 }
 0x4ee   :  { %v450_v50 = vrot.slane %v445_v49, 6 }
 0x4ef   :  { %v2489_v51 = vpop.f32.mrf.mxu1 }
 0x4f0   :  { %v452_v52 = vadd.f32 %v450_v50, %v3064_v31 }
 0x4f2   :  { %v2303_v53 = vmul.f32 -1.442695, %v452_v52 }
 0x4f4   :  { %2686 = vpow2.f32 %v2303_v53 }
 0x4f5   :  { %2688 = vtanh.f32 %v452_v52 }
 0x501   :  { %v2687_v54 = vpop.eup %2686 }
 0x502   :  { %v457_v55 = vadd.f32 1.0, %v2687_v54  ;;  %v2689_v56 = vpop.eup %2688 }
 0x504   :  { %2690 = vrcp.f32 %v457_v55 }
 0x511   :  { %v2691_v57 = vpop.eup %2690 }
 0x512   :  { %v460_v58 = vsel %vm3069_vm8, %v2689_v56, %v2691_v57 }
 0x513   :  { %466 = vrot.lane.b32.xlu0 %v460_v58, %s2897_s5  ;;  %v464_v62 = vmul.f32 %v462_v61, %v460_v58 }
 0x585   :  { %v467_v59 = vpop.permute.xlu0 %466 }
 0x586   :  { %v469_v60 = vmul.f32 %v467_v59, %v460_v58 }
 0x588   :  { %471 = vrot.lane.b32.xlu1 %v469_v60, %s2898_s19 }
 0x5fa   :  { %v472_v63 = vpop.permute.xlu1 %471 }
 0x5fb   :  { %v474_v0 = vadd.f32 %v472_v63, %v464_v62 }
 0x5fd   :  { %2692 = vtanh.f32 %v474_v0  ;;  %v570_v24 = vrot.slane %v474_v0, 6 }
 0x60a   :  { %v2693_v2 = vpop.eup %2692 }
 0x60b   :  { %477 = vrot.lane.b32.xlu0 %v2693_v2, %s2897_s5 }
 0x67d   :  { %v478_v3 = vpop.permute.xlu0 %477 }
 0x67e   :  { %v480_v4 = vmul.f32 %v478_v3, %v460_v58 }
 0x680   :  { %v482_v5 = vrot.slane %v480_v4, 2  ;;  %v1125_v33 = vsel %vm97_vm0, %v3078_v47, %v480_v4 }
 0x682   :  { %483 = vrot.lane.b32.xlu1 %v482_v5, %s2898_s19 }
 0x6f4   :  { %v484_v6 = vpop.permute.xlu1 %483 }
 0x6f5   :  { %2499 = vmatmul.mubr.msk.f32.vlgmr.msra.gmra.mxu0 %vm274_vm9, %v484_v6 }
 0x6f6   :  { %2513 = vmatpush3.msra.mxu0 %v2992_v7  ;;  %2520 = vmatprep.mubr.msk.f32.mxu0 %vm2896_vm4, %v2895_v1 }
 0x6f7   :  { %2514 = vmatprep.subr.mxu0 %v2895_v1 }
 0x6f8   :  { %2515 = vmatpush3.msra.mxu0 %v3017_v20 }
 0x6f9   :  { %2516 = vmatprep.subr.mxu0 %v2895_v1 }
 0x6fa   :  { %2517 = vmatpush3.msra.mxu0 %v3024_v21 }
 0x6fb   :  { %2518 = vmatprep.subr.mxu0 %v2895_v1 }
 0x6fc   :  { %2519 = vmatpush3.msra.mxu0 %v3032_v22 }
 0x6fd   :  { %2534 = vmatprep.subr.mxu0 %v2895_v1 }
 0x7b5   :  { %v553_v8 = vpop.f32.mrf.mxu0 }
 0x7b6   :  { %v558_v9 = vrot.slane %v553_v8, 4 }
 0x7b7   :  { %v2500_v10 = vpop.f32.mrf.mxu0 }
 0x7b8   :  { %v560_v11 = vadd.f32 %v558_v9, %v3064_v31 }
 0x7ba   :  { %v2305_v12 = vmul.f32 -1.442695, %v560_v11 }
 0x7bc   :  { %2694 = vpow2.f32 %v2305_v12 }
 0x7bd   :  { %2696 = vtanh.f32 %v560_v11 }
 0x7c9   :  { %v2695_v13 = vpop.eup %2694 }
 0x7ca   :  { %v565_v15 = vadd.f32 1.0, %v2695_v13  ;;  %v2697_v16 = vpop.eup %2696 }
 0x7cc   :  { %2698 = vrcp.f32 %v565_v15 }
 0x7d9   :  { %v2699_v17 = vpop.eup %2698 }
 0x7da   :  { %v568_v18 = vsel %vm3069_vm8, %v2697_v16, %v2699_v17 }
 0x7db   :  { %574 = vrot.lane.b32.xlu0 %v568_v18, %s2897_s5  ;;  %v572_v25 = vmul.f32 %v570_v24, %v568_v18 }
 0x84d   :  { %v575_v19 = vpop.permute.xlu0 %574 }
 0x84e   :  { %v577_v23 = vmul.f32 %v575_v19, %v568_v18 }
 0x850   :  { %579 = vrot.lane.b32.xlu1 %v577_v23, %s2898_s19 }
 0x8c2   :  { %v580_v26 = vpop.permute.xlu1 %579 }
 0x8c3   :  { %v582_v27 = vadd.f32 %v580_v26, %v572_v25 }
 0x8c5   :  { %2700 = vtanh.f32 %v582_v27  ;;  %v678_v50 = vrot.slane %v582_v27, 6 }
 0x8d2   :  { %v2701_v28 = vpop.eup %2700 }
 0x8d3   :  { %585 = vrot.lane.b32.xlu0 %v2701_v28, %s2897_s5 }
 0x945   :  { %v586_v30 = vpop.permute.xlu0 %585 }
 0x946   :  { %v588_v32 = vmul.f32 %v586_v30, %v568_v18 }
 0x948   :  { %v590_v34 = vrot.slane %v588_v32, 4  ;;  %v1127_v35 = vsel %vm1126_vm10, %v1125_v33, %v588_v32 }
 0x94a   :  { %591 = vrot.lane.b32.xlu1 %v590_v34, %s2898_s19 }
 0x9bc   :  { %v592_v37 = vpop.permute.xlu1 %591 }
 0x9bd   :  { %2510 = vmatmul.mubr.msk.f32.vlgmr.msra.gmra.mxu1 %vm274_vm9, %v592_v37 }
 0x9be   :  { %2524 = vmatpush3.msra.mxu1 %v2992_v7  ;;  %2531 = vmatprep.mubr.msk.f32.mxu1 %vm2896_vm4, %v2895_v1 }
 0x9bf   :  { %2525 = vmatprep.subr.mxu1 %v2895_v1 }
 0x9c0   :  { %2526 = vmatpush3.msra.mxu1 %v3017_v20 }
 0x9c1   :  { %2527 = vmatprep.subr.mxu1 %v2895_v1 }
 0x9c2   :  { %2528 = vmatpush3.msra.mxu1 %v3024_v21 }
 0x9c3   :  { %2529 = vmatprep.subr.mxu1 %v2895_v1 }
 0x9c4   :  { %2530 = vmatpush3.msra.mxu1 %v3032_v22 }
 0x9c5   :  { %2545 = vmatprep.subr.mxu1 %v2895_v1 }
 0xa7d   :  { %v661_v38 = vpop.f32.mrf.mxu1 }
 0xa7e   :  { %v666_v39 = vrot.slane %v661_v38, 2 }
 0xa7f   :  { %v2511_v40 = vpop.f32.mrf.mxu1 }
 0xa80   :  { %v668_v41 = vadd.f32 %v666_v39, %v3064_v31 }
 0xa82   :  { %v2307_v42 = vmul.f32 -1.442695, %v668_v41 }
 0xa84   :  { %2702 = vpow2.f32 %v2307_v42 }
 0xa85   :  { %2704 = vtanh.f32 %v668_v41 }
 0xa91   :  { %v2703_v43 = vpop.eup %2702 }
 0xa92   :  { %v673_v44 = vadd.f32 1.0, %v2703_v43  ;;  %v2705_v45 = vpop.eup %2704 }
 0xa94   :  { %2706 = vrcp.f32 %v673_v44 }
 0xaa1   :  { %v2707_v46 = vpop.eup %2706 }
 0xaa2   :  { %v676_v47 = vsel %vm3069_vm8, %v2705_v45, %v2707_v46 }
 0xaa3   :  { %682 = vrot.lane.b32.xlu0 %v676_v47, %s2897_s5  ;;  %v680_v51 = vmul.f32 %v678_v50, %v676_v47 }
 0xb15   :  { %v683_v48 = vpop.permute.xlu0 %682 }
 0xb16   :  { %v685_v49 = vmul.f32 %v683_v48, %v676_v47 }
 0xb18   :  { %687 = vrot.lane.b32.xlu1 %v685_v49, %s2898_s19 }
 0xb8a   :  { %v688_v31 = vpop.permute.xlu1 %687 }
 0xb8b   :  { %v690_v52 = vadd.f32 %v688_v31, %v680_v51 }
 0xb8d   :  { %2708 = vtanh.f32 %v690_v52  ;;  %v783_v8 = vrot.slane %v690_v52, 6 }
 0xb9a   :  { %v2709_v53 = vpop.eup %2708 }
 0xb9b   :  { %693 = vrot.lane.b32.xlu0 %v2709_v53, %s2897_s5 }
 0xc0d   :  { %v694_v54 = vpop.permute.xlu0 %693 }
 0xc0e   :  { %v696_v55 = vmul.f32 %v694_v54, %v676_v47 }
 0xc10   :  { %v698_v56 = vrot.slane %v696_v55, 6  ;;  %v3139_v57 = vsel %vm1128_vm11, %v1127_v35, %v696_v55 }
 0xc12   :  { %699 = vrot.lane.b32.xlu1 %v698_v56, %s2898_s19 }
 0xc84   :  { %v700_v58 = vpop.permute.xlu1 %699 }
 0xc85   :  { %2521 = vmatmul.mubr.msk.f32.vlgmr.msra.gmra.mxu0 %vm274_vm9, %v700_v58 }
 0xc86   :  { %2535 = vmatpush3.msra.mxu0 %v2992_v7  ;;  %2542 = vmatprep.mubr.msk.f32.mxu0 %vm2896_vm4, %v2895_v1 }
 0xc87   :  { %2536 = vmatprep.subr.mxu0 %v2895_v1 }
 0xc88   :  { %2537 = vmatpush3.msra.mxu0 %v3017_v20 }
 0xc89   :  { %2538 = vmatprep.subr.mxu0 %v2895_v1 }
 0xc8a   :  { %2539 = vmatpush3.msra.mxu0 %v3024_v21 }
 0xc8b   :  { %2540 = vmatprep.subr.mxu0 %v2895_v1 }
 0xc8c   :  { %2541 = vmatpush3.msra.mxu0 %v3032_v22 }
 0xd45   :  { %v769_v59 = vpop.f32.mrf.mxu0 }
 0xd46   :  { %v773_v60 = vadd.f32 %v769_v59, %v3062_v29 }
 0xd47   :  { %v2522_v61 = vpop.f32.mrf.mxu0 }
 0xd48   :  { %v2309_v62 = vmul.f32 -1.442695, %v773_v60 }
 0xd4a   :  { %2710 = vpow2.f32 %v2309_v62 }
 0xd4b   :  { %2712 = vtanh.f32 %v773_v60 }
 0xd57   :  { %v2711_v63 = vpop.eup %2710 }
 0xd58   :  { %v778_v0 = vadd.f32 1.0, %v2711_v63  ;;  %v2713_v2 = vpop.eup %2712 }
 0xd5a   :  { %2714 = vrcp.f32 %v778_v0 }
 0xd67   :  { %v2715_v3 = vpop.eup %2714 }
 0xd68   :  { %v781_v4 = vsel %vm3069_vm8, %v2713_v2, %v2715_v3 }
 0xd69   :  { %787 = vrot.lane.b32.xlu0 %v781_v4, %s2897_s5  ;;  %v785_v9 = vmul.f32 %v783_v8, %v781_v4 }
 0xddb   :  { %v788_v5 = vpop.permute.xlu0 %787 }
 0xddc   :  { %v790_v6 = vmul.f32 %v788_v5, %v781_v4 }
 0xdde   :  { %792 = vrot.lane.b32.xlu1 %v790_v6, %s2898_s19 }
 0xe50   :  { %v793_v10 = vpop.permute.xlu1 %792 }
 0xe51   :  { %v795_v11 = vadd.f32 %v793_v10, %v785_v9 }
 0xe53   :  { %2716 = vtanh.f32 %v795_v11  ;;  %v890_v28 = vrot.slane %v795_v11, 6 }
 0xe60   :  { %v2717_v12 = vpop.eup %2716 }
 0xe61   :  { %798 = vrot.lane.b32.xlu0 %v2717_v12, %s2897_s5 }
 0xed3   :  { %v799_v13 = vpop.permute.xlu0 %798 }
 0xed4   :  { %v3158_v15 = vmul.f32 %v799_v13, %v781_v4 }
 0xed6   :  { %803 = vrot.lane.b32.xlu1 %v3158_v15, %s2898_s19 }
 0xf48   :  { %v804_v16 = vpop.permute.xlu1 %803 }
 0xf49   :  { %2532 = vmatmul.mubr.msk.f32.vlgmr.msra.gmra.mxu1 %vm274_vm9, %v804_v16 }
 0xf4a   :  { %2546 = vmatpush3.msra.mxu1 %v2992_v7  ;;  %2553 = vmatprep.mubr.msk.f32.mxu1 %vm2896_vm4, %v2895_v1 }
 0xf4b   :  { %2547 = vmatprep.subr.mxu1 %v2895_v1 }
 0xf4c   :  { %2548 = vmatpush3.msra.mxu1 %v3017_v20 }
 0xf4d   :  { %2549 = vmatprep.subr.mxu1 %v2895_v1 }
 0xf4e   :  { %2550 = vmatpush3.msra.mxu1 %v3024_v21 }
 0xf4f   :  { %2551 = vmatprep.subr.mxu1 %v2895_v1 }
 0xf50   :  { %2552 = vmatpush3.msra.mxu1 %v3032_v22 }
 0xf51   :  { %2567 = vmatprep.subr.mxu1 %v2895_v1 }
0x1009   :  { %v873_v17 = vpop.f32.mrf.mxu1 }
0x100a   :  { %v878_v18 = vrot.slane %v873_v17, 6 }
0x100b   :  { %v2533_v7 = vpop.f32.mrf.mxu1 }
0x100c   :  { %v880_v19 = vadd.f32 %v878_v18, %v3062_v29  ;;  %v1136_v18 = vld [vmem:[%s3450_s6 + $0x18] sm:$0xff]  ;;  %v1135_v7 = vld [vmem:[%s3450_s6 + $0x10] sm:$0xff] }
0x100d   :  { %2556 = vmatprep.subr.mxu0 %v1136_v18 }
0x100e   :  { %v2311_v23 = vmul.f32 -1.442695, %v880_v19 }
0x1010   :  { %2718 = vpow2.f32 %v2311_v23  ;;  %v1134_v23 = vld [vmem:[%s3450_s6 + $0x8] sm:$0xff] }
0x1011   :  { %2720 = vtanh.f32 %v880_v19  ;;  %v3219_v19 = vld [vmem:[%s3451_s7 + $0x10] sm:$0xff] }
0x101d   :  { %v2719_v24 = vpop.eup %2718 }
0x101e   :  { %v885_v25 = vadd.f32 1.0, %v2719_v24  ;;  %v2721_v20 = vpop.eup %2720  ;;  %v3228_v24 = vld [vmem:[%s3451_s7 + $0x8] sm:$0xff] }
0x1020   :  { %2722 = vrcp.f32 %v885_v25  ;;  %v1133_v25 = vld [vmem:[%s3450_s6] sm:$0xff] }
0x102d   :  { %v2723_v26 = vpop.eup %2722 }
0x102e   :  { %v888_v21 = vsel %vm3069_vm8, %v2721_v20, %v2723_v26  ;;  %v3242_v26 = vld [vmem:[%s3451_s7] sm:$0xff] }
0x102f   :  { %894 = vrot.lane.b32.xlu0 %v888_v21, %s2897_s5  ;;  %v892_v30 = vmul.f32 %v890_v28, %v888_v21 }
0x10a1   :  { %v895_v22 = vpop.permute.xlu0 %894 }
0x10a2   :  { %v897_v27 = vmul.f32 %v895_v22, %v888_v21 }
0x10a4   :  { %899 = vrot.lane.b32.xlu1 %v897_v27, %s2898_s19 }
0x1116   :  { %v900_v32 = vpop.permute.xlu1 %899 }
0x1117   :  { %v902_v33 = vadd.f32 %v900_v32, %v892_v30 }
0x1119   :  { %2724 = vtanh.f32 %v902_v33  ;;  %v998_v31 = vrot.slane %v902_v33, 6  ;;  %v2316_v33 = vld [vmem:[%s3452_s8] ss:$0 sm:$0xff] }
0x1126   :  { %v2725_v34 = vpop.eup %2724 }
0x1127   :  { %905 = vrot.lane.b32.xlu0 %v2725_v34, %s2897_s5 }
0x1199   :  { %v906_v35 = vpop.permute.xlu0 %905 }
0x119a   :  { %v908_v37 = vmul.f32 %v906_v35, %v888_v21 }
0x119c   :  { %v910_v38 = vrot.slane %v908_v37, 2  ;;  %v1130_v59 = vsel %vm97_vm0, %v3158_v15, %v908_v37 }
0x119e   :  { %911 = vrot.lane.b32.xlu1 %v910_v38, %s2898_s19 }
0x1210   :  { %v912_v39 = vpop.permute.xlu1 %911 }
0x1211   :  { %2543 = vmatmul.mubr.msk.f32.vlgmr.msra.gmra.mxu0 %vm274_vm9, %v912_v39 }
0x1212   :  { %2557 = vmatpush3.msra.mxu0 %v1136_v18 }
0x1213   :  { %2558 = vmatprep.subr.mxu0 %v1135_v7 }
0x1214   :  { %2559 = vmatpush3.msra.mxu0 %v1135_v7 }
0x1215   :  { %2560 = vmatprep.subr.mxu0 %v1134_v23 }
0x1216   :  { %2561 = vmatpush3.msra.mxu0 %v1134_v23 }
0x1217   :  { %2562 = vmatprep.subr.mxu0 %v1133_v25 }
0x1218   :  { %2563 = vmatpush3.msra.mxu0 %v1133_v25 }
0x1219   :  { %2578 = vmatprep.subr.mxu0 %v2895_v1 }
0x12d1   :  { %v981_v40 = vpop.f32.mrf.mxu0 }
0x12d2   :  { %v986_v41 = vrot.slane %v981_v40, 4 }
0x12d3   :  { %v2544_v42 = vpop.f32.mrf.mxu0 }
0x12d4   :  { %v988_v43 = vadd.f32 %v986_v41, %v3062_v29 }
0x12d6   :  { %v2313_v44 = vmul.f32 -1.442695, %v988_v43 }
0x12d8   :  { %2726 = vpow2.f32 %v2313_v44 }
0x12d9   :  { %2728 = vtanh.f32 %v988_v43 }
0x12e5   :  { %v2727_v45 = vpop.eup %2726 }
0x12e6   :  { %v993_v46 = vadd.f32 1.0, %v2727_v45  ;;  %v2729_v47 = vpop.eup %2728 }
0x12e8   :  { %2730 = vrcp.f32 %v993_v46 }
0x12f5   :  { %v2731_v48 = vpop.eup %2730 }
0x12f6   :  { %v996_v49 = vsel %vm3069_vm8, %v2729_v47, %v2731_v48 }
0x12f7   :  { %1002 = vrot.lane.b32.xlu0 %v996_v49, %s2897_s5  ;;  %v1000_v52 = vmul.f32 %v998_v31, %v996_v49 }
0x1369   :  { %v1003_v50 = vpop.permute.xlu0 %1002 }
0x136a   :  { %v1005_v51 = vmul.f32 %v1003_v50, %v996_v49 }
0x136c   :  { %1007 = vrot.lane.b32.xlu1 %v1005_v51, %s2898_s19 }
0x13de   :  { %v1008_v53 = vpop.permute.xlu1 %1007 }
0x13df   :  { %v1010_v54 = vadd.f32 %v1008_v53, %v1000_v52 }
0x13e1   :  { %2732 = vtanh.f32 %v1010_v54 }
0x13ee   :  { %v2733_v55 = vpop.eup %2732 }
0x13ef   :  { %1013 = vrot.lane.b32.xlu0 %v2733_v55, %s2897_s5 }
0x1461   :  { %v1014_v56 = vpop.permute.xlu0 %1013 }
0x1462   :  { %v1016_v58 = vmul.f32 %v1014_v56, %v996_v49 }
0x1464   :  { %v1018_v60 = vrot.slane %v1016_v58, 4  ;;  %v3190_v61 = vsel %vm1126_vm10, %v1130_v59, %v1016_v58 }
0x1466   :  { %1019 = vrot.lane.b32.xlu1 %v1018_v60, %s2898_s19 }
0x14d8   :  { %v1020_v62 = vpop.permute.xlu1 %1019 }
0x14d9   :  { %2554 = vmatmul.mubr.msk.f32.vlgmr.msra.gmra.mxu1 %vm274_vm9, %v1020_v62 }
0x14da   :  { %2575 = vmatprep.mubr.msk.f32.mxu1 %vm2896_vm4, %v2895_v1 }
0x1599   :  { %v1089_v63 = vpop.f32.mrf.mxu1 }
0x159a   :  { %v1094_v0 = vrot.slane %v1089_v63, 2 }
0x159b   :  { %v2555_v2 = vpop.f32.mrf.mxu1 }
0x159c   :  { %v1096_v3 = vadd.f32 %v1094_v0, %v3062_v29  ;;  %v1106_v29 = vrot.slane %v1010_v54, 6 }
0x159e   :  { %v2315_v4 = vmul.f32 -1.442695, %v1096_v3 }
0x15a0   :  { %2734 = vpow2.f32 %v2315_v4 }
0x15a1   :  { %2736 = vtanh.f32 %v1096_v3 }
0x15ad   :  { %v2735_v5 = vpop.eup %2734 }
0x15ae   :  { %v1101_v6 = vadd.f32 1.0, %v2735_v5  ;;  %v2737_v8 = vpop.eup %2736 }
0x15b0   :  { %2738 = vrcp.f32 %v1101_v6 }
0x15bd   :  { %v2739_v9 = vpop.eup %2738 }
0x15be   :  { %v1104_v10 = vsel %vm3069_vm8, %v2737_v8, %v2739_v9 }
0x15bf   :  { %1110 = vrot.lane.b32.xlu0 %v1104_v10, %s2897_s5  ;;  %v1108_v13 = vmul.f32 %v1106_v29, %v1104_v10 }
0x1631   :  { %v1111_v11 = vpop.permute.xlu0 %1110 }
0x1632   :  { %v1113_v12 = vmul.f32 %v1111_v11, %v1104_v10 }
0x1634   :  { %1115 = vrot.lane.b32.xlu1 %v1113_v12, %s2898_s19 }
0x1638   :  { %1150 = vrot.lane.b32.xlu1 %v3139_v57, %s2898_s19  ;;  %v3213_v57 = vld [vmem:[%s3451_s7 + $0x18] sm:$0xff] }
0x1639   :  { %2568 = vmatpush3.msra.mxu1 %v3213_v57 }
0x163a   :  { %2569 = vmatprep.subr.mxu1 %v2895_v1 }
0x163b   :  { %2570 = vmatpush3.msra.mxu1 %v3219_v19 }
0x163c   :  { %2571 = vmatprep.subr.mxu1 %v2895_v1 }
0x163d   :  { %2572 = vmatpush3.msra.mxu1 %v3228_v24 }
0x163e   :  { %2573 = vmatprep.subr.mxu1 %v2895_v1 }
0x163f   :  { %2574 = vmatpush3.msra.mxu1 %v3242_v26 }
0x1640   :  { %2576 = vmatmul.mubr.f32.vlgmr.msra.gmra.mxu1 %v2895_v1  ;;  %2589 = vmatprep.subr.mxu1 %v2895_v1 }
0x1641   :  { %2590 = vmatpush3.msra.mxu1 %v3213_v57  ;;  %2597 = vmatprep.mubr.msk.f32.mxu1 %vm2896_vm4, %v2895_v1 }
0x1642   :  { %2591 = vmatprep.subr.mxu1 %v2895_v1 }
0x1643   :  { %2592 = vmatpush3.msra.mxu1 %v3219_v19 }
0x1644   :  { %2593 = vmatprep.subr.mxu1 %v2895_v1 }
0x1645   :  { %2594 = vmatpush3.msra.mxu1 %v3228_v24 }
0x1646   :  { %2595 = vmatprep.subr.mxu1 %v2895_v1 }
0x1647   :  { %2596 = vmatpush3.msra.mxu1 %v3242_v26 }
0x1648   :  { %2611 = vmatprep.subr.mxu1 %v2895_v1 }
0x16a6   :  { %v1116_v15 = vpop.permute.xlu1 %1115 }
0x16a7   :  { %v1118_v16 = vadd.f32 %v1116_v15, %v1108_v13 }
0x16a9   :  { %2740 = vtanh.f32 %v1118_v16 }
0x16aa   :  { %v1151_v17 = vpop.permute.xlu1 %1150 }
0x16ab   :  { %2564 = vmatprep.mubr.msk.f32.mxu0 %vm274_vm9, %v1151_v17 }
0x16b6   :  { %v2741_v20 = vpop.eup %2740 }
0x16b7   :  { %1121 = vrot.lane.b32.xlu0 %v2741_v20, %s2897_s5 }
0x1700   :  { %v1299_v30 = vpop.f32.mrf.mxu1 }
0x1702   :  { %v2577_v32 = vpop.f32.mrf.mxu1 }
0x1729   :  { %v1122_v21 = vpop.permute.xlu0 %1121 }
0x172a   :  { %v1124_v22 = vmul.f32 %v1122_v21, %v1104_v10 }
0x172c   :  { %v1132_v27 = vsel %vm1128_vm11, %v3190_v61, %v1124_v22 }
0x172d   :  { %1152 = vrot.lane.b32.xlu0 %v1132_v27, %s2898_s19 }
0x179f   :  { %v1153_v28 = vpop.permute.xlu0 %1152 }
0x17a0   :  { %2565 = vmatmul.mubr.msk.f32.vlgmr.msra.gmra.mxu0 %vm274_vm9, %v1153_v28 }
0x17a1   :  { %2579 = vmatpush3.msra.mxu0 %v3213_v57  ;;  %2586 = vmatprep.mubr.msk.f32.mxu0 %vm2896_vm4, %v2895_v1 }
0x17a2   :  { %2580 = vmatprep.subr.mxu0 %v2895_v1 }
0x17a3   :  { %2581 = vmatpush3.msra.mxu0 %v3219_v19 }
0x17a4   :  { %2582 = vmatprep.subr.mxu0 %v2895_v1 }
0x17a5   :  { %2583 = vmatpush3.msra.mxu0 %v3228_v24 }
0x17a6   :  { %2584 = vmatprep.subr.mxu0 %v2895_v1 }
0x17a7   :  { %2585 = vmatpush3.msra.mxu0 %v3242_v26 }
0x17a8   :  { %2600 = vmatprep.subr.mxu0 %v2895_v1 }
0x1860   :  { %v2566_v34 = vpop.f32.mrf.mxu0 }
0x1861   :  { %v3274_v35 = vadd.f32 %v2566_v34, %v2316_v33 }
0x1862   :  { %v1224_v37 = vpop.f32.mrf.mxu0 }
0x1863   :  { %v3276_v38 = vadd.f32 %v2316_v33, %v1224_v37 }
0x1865   :  { %v1303_v39 = vadd.f32 %v1299_v30, %v3276_v38 }
0x1867   :  { %v2319_v40 = vmul.f32 -1.442695, %v1303_v39 }
0x1869   :  { %2742 = vpow2.f32 %v2319_v40 }
0x186a   :  { %2744 = vtanh.f32 %v1303_v39 }
0x1876   :  { %v2743_v41 = vpop.eup %2742 }
0x1877   :  { %v1308_v42 = vadd.f32 1.0, %v2743_v41  ;;  %v2745_v43 = vpop.eup %2744 }
0x1879   :  { %2746 = vrcp.f32 %v1308_v42 }
0x1886   :  { %v2747_v44 = vpop.eup %2746 }
0x1887   :  { %v1311_v45 = vsel %vm3069_vm8, %v2745_v43, %v2747_v44 }
0x1888   :  { %1314 = vrot.lane.b32.xlu1 %v1311_v45, %s2897_s5  ;;  %v1312_v48 = vmul.f32 0.0, %v1311_v45 }
0x18fa   :  { %v1315_v46 = vpop.permute.xlu1 %1314 }
0x18fb   :  { %v1317_v47 = vmul.f32 %v1315_v46, %v1311_v45 }
0x18fd   :  { %1319 = vrot.lane.b32.xlu0 %v1317_v47, %s2898_s19 }
0x196f   :  { %v1320_v49 = vpop.permute.xlu0 %1319 }
0x1970   :  { %v1322_v50 = vadd.f32 %v1320_v49, %v1312_v48 }
0x1972   :  { %2748 = vtanh.f32 %v1322_v50  ;;  %v1417_v4 = vrot.slane %v1322_v50, 6 }
0x197f   :  { %v2749_v51 = vpop.eup %2748 }
0x1980   :  { %1325 = vrot.lane.b32.xlu1 %v2749_v51, %s2897_s5 }
0x19f2   :  { %v1326_v31 = vpop.permute.xlu1 %1325 }
0x19f3   :  { %v3284_v52 = vmul.f32 %v1326_v31, %v1311_v45 }
0x19f5   :  { %1330 = vrot.lane.b32.xlu0 %v3284_v52, %s2898_s19 }
0x1a67   :  { %v1331_v53 = vpop.permute.xlu0 %1330 }
0x1a68   :  { %2587 = vmatmul.mubr.msk.f32.vlgmr.msra.gmra.mxu0 %vm274_vm9, %v1331_v53 }
0x1a69   :  { %2601 = vmatpush3.msra.mxu0 %v3213_v57  ;;  %2608 = vmatprep.mubr.msk.f32.mxu0 %vm2896_vm4, %v2895_v1 }
0x1a6a   :  { %2602 = vmatprep.subr.mxu0 %v2895_v1 }
0x1a6b   :  { %2603 = vmatpush3.msra.mxu0 %v3219_v19 }
0x1a6c   :  { %2604 = vmatprep.subr.mxu0 %v2895_v1 }
0x1a6d   :  { %2605 = vmatpush3.msra.mxu0 %v3228_v24 }
0x1a6e   :  { %2606 = vmatprep.subr.mxu0 %v2895_v1 }
0x1a6f   :  { %2607 = vmatpush3.msra.mxu0 %v3242_v26 }
0x1a70   :  { %2622 = vmatprep.subr.mxu0 %v2895_v1 }
0x1b28   :  { %v1400_v54 = vpop.f32.mrf.mxu0 }
0x1b29   :  { %v1405_v55 = vrot.slane %v1400_v54, 6 }
0x1b2a   :  { %v2588_v56 = vpop.f32.mrf.mxu0 }
0x1b2b   :  { %v1407_v58 = vadd.f32 %v1405_v55, %v3276_v38 }
0x1b2d   :  { %v2321_v59 = vmul.f32 -1.442695, %v1407_v58 }
0x1b2f   :  { %2750 = vpow2.f32 %v2321_v59 }
0x1b30   :  { %2752 = vtanh.f32 %v1407_v58 }
0x1b3c   :  { %v2751_v60 = vpop.eup %2750 }
0x1b3d   :  { %v1412_v61 = vadd.f32 1.0, %v2751_v60  ;;  %v2753_v62 = vpop.eup %2752 }
0x1b3f   :  { %2754 = vrcp.f32 %v1412_v61 }
0x1b4c   :  { %v2755_v63 = vpop.eup %2754 }
0x1b4d   :  { %v1415_v0 = vsel %vm3069_vm8, %v2753_v62, %v2755_v63 }
0x1b4e   :  { %1421 = vrot.lane.b32.xlu1 %v1415_v0, %s2897_s5  ;;  %v1419_v5 = vmul.f32 %v1417_v4, %v1415_v0 }
0x1bc0   :  { %v1422_v2 = vpop.permute.xlu1 %1421 }
0x1bc1   :  { %v1424_v3 = vmul.f32 %v1422_v2, %v1415_v0 }
0x1bc3   :  { %1426 = vrot.lane.b32.xlu0 %v1424_v3, %s2898_s19 }
0x1c35   :  { %v1427_v6 = vpop.permute.xlu0 %1426 }
0x1c36   :  { %v1429_v8 = vadd.f32 %v1427_v6, %v1419_v5 }
0x1c38   :  { %2756 = vtanh.f32 %v1429_v8  ;;  %v1525_v28 = vrot.slane %v1429_v8, 6 }
0x1c45   :  { %v2757_v9 = vpop.eup %2756 }
0x1c46   :  { %1432 = vrot.lane.b32.xlu1 %v2757_v9, %s2897_s5 }
0x1cb8   :  { %v1433_v10 = vpop.permute.xlu1 %1432 }
0x1cb9   :  { %v1435_v11 = vmul.f32 %v1433_v10, %v1415_v0 }
0x1cbb   :  { %v1437_v12 = vrot.slane %v1435_v11, 2  ;;  %v2080_v40 = vsel %vm97_vm0, %v3284_v52, %v1435_v11 }
0x1cbd   :  { %1438 = vrot.lane.b32.xlu0 %v1437_v12, %s2898_s19 }
0x1d2f   :  { %v1439_v29 = vpop.permute.xlu0 %1438 }
0x1d30   :  { %2598 = vmatmul.mubr.msk.f32.vlgmr.msra.gmra.mxu1 %vm274_vm9, %v1439_v29 }
0x1d31   :  { %2612 = vmatpush3.msra.mxu1 %v3213_v57  ;;  %2619 = vmatprep.mubr.msk.f32.mxu1 %vm2896_vm4, %v2895_v1 }
0x1d32   :  { %2613 = vmatprep.subr.mxu1 %v2895_v1 }
0x1d33   :  { %2614 = vmatpush3.msra.mxu1 %v3219_v19 }
0x1d34   :  { %2615 = vmatprep.subr.mxu1 %v2895_v1 }
0x1d35   :  { %2616 = vmatpush3.msra.mxu1 %v3228_v24 }
0x1d36   :  { %2617 = vmatprep.subr.mxu1 %v2895_v1 }
0x1d37   :  { %2618 = vmatpush3.msra.mxu1 %v3242_v26 }
0x1d38   :  { %2633 = vmatprep.subr.mxu1 %v2895_v1 }
0x1df0   :  { %v1508_v13 = vpop.f32.mrf.mxu1 }
0x1df1   :  { %v1513_v15 = vrot.slane %v1508_v13, 4 }
0x1df2   :  { %v2599_v16 = vpop.f32.mrf.mxu1 }
0x1df3   :  { %v1515_v17 = vadd.f32 %v1513_v15, %v3276_v38 }
0x1df5   :  { %v2323_v18 = vmul.f32 -1.442695, %v1515_v17 }
0x1df7   :  { %2758 = vpow2.f32 %v2323_v18 }
0x1df8   :  { %2760 = vtanh.f32 %v1515_v17 }
0x1e04   :  { %v2759_v7 = vpop.eup %2758 }
0x1e05   :  { %v1520_v23 = vadd.f32 1.0, %v2759_v7  ;;  %v2761_v25 = vpop.eup %2760 }
0x1e07   :  { %2762 = vrcp.f32 %v1520_v23 }
0x1e14   :  { %v2763_v20 = vpop.eup %2762 }
0x1e15   :  { %v1523_v21 = vsel %vm3069_vm8, %v2761_v25, %v2763_v20 }
0x1e16   :  { %1529 = vrot.lane.b32.xlu1 %v1523_v21, %s2897_s5  ;;  %v1527_v30 = vmul.f32 %v1525_v28, %v1523_v21 }
0x1e88   :  { %v1530_v22 = vpop.permute.xlu1 %1529 }
0x1e89   :  { %v1532_v27 = vmul.f32 %v1530_v22, %v1523_v21 }
0x1e8b   :  { %1534 = vrot.lane.b32.xlu0 %v1532_v27, %s2898_s19 }
0x1efd   :  { %v1535_v32 = vpop.permute.xlu0 %1534 }
0x1efe   :  { %v1537_v33 = vadd.f32 %v1535_v32, %v1527_v30 }
0x1f00   :  { %2764 = vtanh.f32 %v1537_v33  ;;  %v1633_v55 = vrot.slane %v1537_v33, 6 }
0x1f0d   :  { %v2765_v34 = vpop.eup %2764 }
0x1f0e   :  { %1540 = vrot.lane.b32.xlu1 %v2765_v34, %s2897_s5 }
0x1f80   :  { %v1541_v37 = vpop.permute.xlu1 %1540 }
0x1f81   :  { %v1543_v39 = vmul.f32 %v1541_v37, %v1523_v21 }
0x1f83   :  { %v1545_v41 = vrot.slane %v1543_v39, 4  ;;  %v2081_v42 = vsel %vm1126_vm10, %v2080_v40, %v1543_v39 }
0x1f85   :  { %1546 = vrot.lane.b32.xlu0 %v1545_v41, %s2898_s19 }
0x1ff7   :  { %v1547_v43 = vpop.permute.xlu0 %1546 }
0x1ff8   :  { %2609 = vmatmul.mubr.msk.f32.vlgmr.msra.gmra.mxu0 %vm274_vm9, %v1547_v43 }
0x1ff9   :  { %2623 = vmatpush3.msra.mxu0 %v3213_v57  ;;  %2630 = vmatprep.mubr.msk.f32.mxu0 %vm2896_vm4, %v2895_v1 }
0x1ffa   :  { %2624 = vmatprep.subr.mxu0 %v2895_v1 }
0x1ffb   :  { %2625 = vmatpush3.msra.mxu0 %v3219_v19 }
0x1ffc   :  { %2626 = vmatprep.subr.mxu0 %v2895_v1 }
0x1ffd   :  { %2627 = vmatpush3.msra.mxu0 %v3228_v24 }
0x1ffe   :  { %2628 = vmatprep.subr.mxu0 %v2895_v1 }
0x1fff   :  { %2629 = vmatpush3.msra.mxu0 %v3242_v26 }
0x2000   :  { %2644 = vmatprep.subr.mxu0 %v2895_v1 }
0x20b8   :  { %v1616_v44 = vpop.f32.mrf.mxu0 }
0x20b9   :  { %v1621_v45 = vrot.slane %v1616_v44, 2 }
0x20ba   :  { %v2610_v46 = vpop.f32.mrf.mxu0 }
0x20bb   :  { %v1623_v47 = vadd.f32 %v1621_v45, %v3276_v38 }
0x20bd   :  { %v2325_v48 = vmul.f32 -1.442695, %v1623_v47 }
0x20bf   :  { %2766 = vpow2.f32 %v2325_v48 }
0x20c0   :  { %2768 = vtanh.f32 %v1623_v47 }
0x20cc   :  { %v2767_v49 = vpop.eup %2766 }
0x20cd   :  { %v1628_v50 = vadd.f32 1.0, %v2767_v49  ;;  %v2769_v51 = vpop.eup %2768 }
0x20cf   :  { %2770 = vrcp.f32 %v1628_v50 }
0x20dc   :  { %v2771_v31 = vpop.eup %2770 }
0x20dd   :  { %v1631_v52 = vsel %vm3069_vm8, %v2769_v51, %v2771_v31 }
0x20de   :  { %1637 = vrot.lane.b32.xlu1 %v1631_v52, %s2897_s5  ;;  %v1635_v56 = vmul.f32 %v1633_v55, %v1631_v52 }
0x2150   :  { %v1638_v53 = vpop.permute.xlu1 %1637 }
0x2151   :  { %v1640_v54 = vmul.f32 %v1638_v53, %v1631_v52 }
0x2153   :  { %1642 = vrot.lane.b32.xlu0 %v1640_v54, %s2898_s19 }
0x21c5   :  { %v1643_v38 = vpop.permute.xlu0 %1642 }
0x21c6   :  { %v1645_v58 = vadd.f32 %v1643_v38, %v1635_v56 }
0x21c8   :  { %2772 = vtanh.f32 %v1645_v58  ;;  %v1738_v13 = vrot.slane %v1645_v58, 6 }
0x21d5   :  { %v2773_v59 = vpop.eup %2772 }
0x21d6   :  { %1648 = vrot.lane.b32.xlu1 %v2773_v59, %s2897_s5 }
0x2248   :  { %v1649_v60 = vpop.permute.xlu1 %1648 }
0x2249   :  { %v1651_v61 = vmul.f32 %v1649_v60, %v1631_v52 }
0x224b   :  { %v1653_v62 = vrot.slane %v1651_v61, 6  ;;  %v3345_v63 = vsel %vm1128_vm11, %v2081_v42, %v1651_v61 }
0x224d   :  { %1654 = vrot.lane.b32.xlu0 %v1653_v62, %s2898_s19 }
0x22bf   :  { %v1655_v0 = vpop.permute.xlu0 %1654 }
0x22c0   :  { %2620 = vmatmul.mubr.msk.f32.vlgmr.msra.gmra.mxu1 %vm274_vm9, %v1655_v0 }
0x22c1   :  { %2634 = vmatpush3.msra.mxu1 %v3213_v57  ;;  %2641 = vmatprep.mubr.msk.f32.mxu1 %vm2896_vm4, %v2895_v1 }
0x22c2   :  { %2635 = vmatprep.subr.mxu1 %v2895_v1 }
0x22c3   :  { %2636 = vmatpush3.msra.mxu1 %v3219_v19 }
0x22c4   :  { %2637 = vmatprep.subr.mxu1 %v2895_v1 }
0x22c5   :  { %2638 = vmatpush3.msra.mxu1 %v3228_v24 }
0x22c6   :  { %2639 = vmatprep.subr.mxu1 %v2895_v1 }
0x22c7   :  { %2640 = vmatpush3.msra.mxu1 %v3242_v26 }
0x22c8   :  { %2655 = vmatprep.subr.mxu1 %v2089_v36 }
0x2380   :  { %v1724_v2 = vpop.f32.mrf.mxu1 }
0x2381   :  { %v1728_v3 = vadd.f32 %v1724_v2, %v3274_v35 }
0x2382   :  { %v2621_v4 = vpop.f32.mrf.mxu1 }
0x2383   :  { %v2327_v5 = vmul.f32 -1.442695, %v1728_v3 }
0x2385   :  { %2774 = vpow2.f32 %v2327_v5 }
0x2386   :  { %2776 = vtanh.f32 %v1728_v3 }
0x2392   :  { %v2775_v6 = vpop.eup %2774 }
0x2393   :  { %v1733_v8 = vadd.f32 1.0, %v2775_v6  ;;  %v2777_v9 = vpop.eup %2776 }
0x2395   :  { %2778 = vrcp.f32 %v1733_v8 }
0x23a2   :  { %v2779_v10 = vpop.eup %2778 }
0x23a3   :  { %v1736_v11 = vsel %vm3069_vm8, %v2777_v9, %v2779_v10 }
0x23a4   :  { %1742 = vrot.lane.b32.xlu1 %v1736_v11, %s2897_s5  ;;  %v1740_v15 = vmul.f32 %v1738_v13, %v1736_v11 }
0x2416   :  { %v1743_v12 = vpop.permute.xlu1 %1742 }
0x2417   :  { %v1745_v29 = vmul.f32 %v1743_v12, %v1736_v11 }
0x2419   :  { %1747 = vrot.lane.b32.xlu0 %v1745_v29, %s2898_s19 }
0x248b   :  { %v1748_v16 = vpop.permute.xlu0 %1747 }
0x248c   :  { %v1750_v17 = vadd.f32 %v1748_v16, %v1740_v15 }
0x248e   :  { %2780 = vtanh.f32 %v1750_v17  ;;  %v1845_v34 = vrot.slane %v1750_v17, 6 }
0x249b   :  { %v2781_v18 = vpop.eup %2780 }
0x249c   :  { %1753 = vrot.lane.b32.xlu1 %v2781_v18, %s2897_s5 }
0x250e   :  { %v1754_v7 = vpop.permute.xlu1 %1753 }
0x250f   :  { %v3364_v23 = vmul.f32 %v1754_v7, %v1736_v11 }
0x2511   :  { %1758 = vrot.lane.b32.xlu0 %v3364_v23, %s2898_s19 }
0x2583   :  { %v1759_v25 = vpop.permute.xlu0 %1758 }
0x2584   :  { %2631 = vmatmul.mubr.msk.f32.vlgmr.msra.gmra.mxu0 %vm274_vm9, %v1759_v25 }
0x2585   :  { %2645 = vmatpush3.msra.mxu0 %v3213_v57  ;;  %2652 = vmatprep.mubr.msk.f32.mxu0 %vm2896_vm4, %v2895_v1 }
0x2586   :  { %2646 = vmatprep.subr.mxu0 %v2895_v1 }
0x2587   :  { %2647 = vmatpush3.msra.mxu0 %v3219_v19 }
0x2588   :  { %2648 = vmatprep.subr.mxu0 %v2895_v1 }
0x2589   :  { %2649 = vmatpush3.msra.mxu0 %v3228_v24 }
0x258a   :  { %2650 = vmatprep.subr.mxu0 %v2895_v1 }
0x258b   :  { %2651 = vmatpush3.msra.mxu0 %v3242_v26 }
0x2644   :  { %v1828_v20 = vpop.f32.mrf.mxu0 }
0x2645   :  { %v1833_v21 = vrot.slane %v1828_v20, 6 }
0x2646   :  { %v2632_v22 = vpop.f32.mrf.mxu0 }
0x2647   :  { %v1835_v57 = vadd.f32 %v1833_v21, %v3274_v35  ;;  %v2088_v21 = vld [vmem:[%s3453_s9 + $0x10] sm:$0xff]  ;;  %v2086_v22 = vld [vmem:[%s3453_s9] sm:$0xff] }
0x2649   :  { %v2329_v27 = vmul.f32 -1.442695, %v1835_v57 }
0x264b   :  { %2782 = vpow2.f32 %v2329_v27 }
0x264c   :  { %2784 = vtanh.f32 %v1835_v57 }
0x2658   :  { %v2783_v28 = vpop.eup %2782 }
0x2659   :  { %v1840_v30 = vadd.f32 1.0, %v2783_v28  ;;  %v2785_v19 = vpop.eup %2784 }
0x265b   :  { %2786 = vrcp.f32 %v1840_v30 }
0x2668   :  { %v2787_v32 = vpop.eup %2786 }
0x2669   :  { %v1843_v24 = vsel %vm3069_vm8, %v2785_v19, %v2787_v32  ;;  %v2334_v32 = vld [vmem:[#allocation5] ss:$0 sm:$0xff] }
0x266a   :  { %1849 = vrot.lane.b32.xlu1 %v1843_v24, %s2897_s5  ;;  %v1847_v37 = vmul.f32 %v1845_v34, %v1843_v24 }
0x26dc   :  { %v1850_v33 = vpop.permute.xlu1 %1849 }
0x26dd   :  { %v1852_v26 = vmul.f32 %v1850_v33, %v1843_v24 }
0x26df   :  { %1854 = vrot.lane.b32.xlu0 %v1852_v26, %s2898_s19 }
0x2751   :  { %v1855_v39 = vpop.permute.xlu0 %1854 }
0x2752   :  { %v1857_v40 = vadd.f32 %v1855_v39, %v1847_v37 }
0x2754   :  { %2788 = vtanh.f32 %v1857_v40  ;;  %v1953_v38 = vrot.slane %v1857_v40, 6 }
0x2761   :  { %v2789_v41 = vpop.eup %2788 }
0x2762   :  { %1860 = vrot.lane.b32.xlu1 %v2789_v41, %s2897_s5 }
0x27d4   :  { %v1861_v42 = vpop.permute.xlu1 %1860 }
0x27d5   :  { %v1863_v43 = vmul.f32 %v1861_v42, %v1843_v24 }
0x27d7   :  { %v1865_v44 = vrot.slane %v1863_v43, 2  ;;  %v2083_v2 = vsel %vm97_vm0, %v3364_v23, %v1863_v43  ;;  %vm2250_vm0 = vcmask 7168  }
0x27d9   :  { %1866 = vrot.lane.b32.xlu0 %v1865_v44, %s2898_s19 }
0x284b   :  { %v1867_v45 = vpop.permute.xlu0 %1866 }
0x284c   :  { %2642 = vmatmul.mubr.msk.f32.vlgmr.msra.gmra.mxu1 %vm274_vm9, %v1867_v45 }
0x284d   :  { %2656 = vmatpush3.msra.mxu1 %v2089_v36 }
0x284e   :  { %2657 = vmatprep.subr.mxu1 %v2088_v21 }
0x284f   :  { %2658 = vmatpush3.msra.mxu1 %v2088_v21 }
0x290c   :  { %v1936_v46 = vpop.f32.mrf.mxu1 }
0x290d   :  { %v1941_v47 = vrot.slane %v1936_v46, 4 }
0x290e   :  { %v2643_v48 = vpop.f32.mrf.mxu1 }
0x290f   :  { %v1943_v49 = vadd.f32 %v1941_v47, %v3274_v35 }
0x2911   :  { %v2331_v50 = vmul.f32 -1.442695, %v1943_v49 }
0x2913   :  { %2790 = vpow2.f32 %v2331_v50 }
0x2914   :  { %2792 = vtanh.f32 %v1943_v49 }
0x2920   :  { %v2791_v51 = vpop.eup %2790 }
0x2921   :  { %v1948_v31 = vadd.f32 1.0, %v2791_v51  ;;  %v2793_v52 = vpop.eup %2792 }
0x2923   :  { %2794 = vrcp.f32 %v1948_v31 }
0x2930   :  { %v2795_v53 = vpop.eup %2794 }
0x2931   :  { %v1951_v54 = vsel %vm3069_vm8, %v2793_v52, %v2795_v53 }
0x2932   :  { %1957 = vrot.lane.b32.xlu1 %v1951_v54, %s2897_s5  ;;  %v1955_v58 = vmul.f32 %v1953_v38, %v1951_v54 }
0x29a4   :  { %v1958_v55 = vpop.permute.xlu1 %1957 }
0x29a5   :  { %v1960_v56 = vmul.f32 %v1958_v55, %v1951_v54 }
0x29a7   :  { %1962 = vrot.lane.b32.xlu0 %v1960_v56, %s2898_s19 }
0x2a19   :  { %v1963_v59 = vpop.permute.xlu0 %1962 }
0x2a1a   :  { %v1965_v60 = vadd.f32 %v1963_v59, %v1955_v58 }
0x2a1c   :  { %2796 = vtanh.f32 %v1965_v60 }
0x2a29   :  { %v2797_v61 = vpop.eup %2796 }
0x2a2a   :  { %1968 = vrot.lane.b32.xlu1 %v2797_v61, %s2897_s5  ;;  %v2204_v61 = vld [vmem:[%s3445_s1] sm:$0xff] }
0x2a2b   :  { %vm2242_vm15 = vcmp.ne.s32.totalorder %v2204_v61, 9 }
0x2a9c   :  { %v1969_v62 = vpop.permute.xlu1 %1968 }
0x2a9d   :  { %v1971_v0 = vmul.f32 %v1969_v62, %v1951_v54  ;;  %v2205_v62 = vld [vmem:[%s3445_s1 + $0x8] sm:$0xff]  ;;  %s2899_s1 = smov [#allocation7]  }
0x2a9e   :  { %vm2243_vm14 = vcmp.ne.s32.totalorder %v2205_v62, 9 }
0x2a9f   :  { %v1973_v3 = vrot.slane %v1971_v0, 4  ;;  %v2084_v4 = vsel %vm1126_vm10, %v2083_v2, %v1971_v0 }
0x2aa1   :  { %1974 = vrot.lane.b32.xlu0 %v1973_v3, %s2898_s19 }
0x2b13   :  { %v1975_v5 = vpop.permute.xlu0 %1974 }
0x2b14   :  { %2653 = vmatmul.mubr.msk.f32.vlgmr.msra.gmra.mxu0 %vm274_vm9, %v1975_v5 }
0x2bd4   :  { %v2044_v6 = vpop.f32.mrf.mxu0 }
0x2bd5   :  { %v2049_v8 = vrot.slane %v2044_v6, 2 }
0x2bd6   :  { %v2654_v9 = vpop.f32.mrf.mxu0 }
0x2bd7   :  { %v2051_v10 = vadd.f32 %v2049_v8, %v3274_v35  ;;  %v2061_v35 = vrot.slane %v1965_v60, 6 }
0x2bd9   :  { %v2333_v11 = vmul.f32 -1.442695, %v2051_v10 }
0x2bdb   :  { %2798 = vpow2.f32 %v2333_v11 }
0x2bdc   :  { %2800 = vtanh.f32 %v2051_v10 }
0x2be8   :  { %v2799_v12 = vpop.eup %2798 }
0x2be9   :  { %v2056_v29 = vadd.f32 1.0, %v2799_v12  ;;  %v2801_v13 = vpop.eup %2800 }
0x2beb   :  { %2802 = vrcp.f32 %v2056_v29 }
0x2bf8   :  { %v2803_v15 = vpop.eup %2802 }
0x2bf9   :  { %v2059_v16 = vsel %vm3069_vm8, %v2801_v13, %v2803_v15  ;;  %v2337_v13 = vsel %vm2242_vm15, 1.0, %v2895_v1  ;;  %v2338_v15 = vsel %vm2243_vm14, 1.0, %v2895_v1 }
0x2bfa   :  { %2065 = vrot.lane.b32.xlu1 %v2059_v16, %s2897_s5  ;;  %v2063_v7 = vmul.f32 %v2061_v35, %v2059_v16 }
0x2c6c   :  { %v2066_v17 = vpop.permute.xlu1 %2065 }
0x2c6d   :  { %v2068_v18 = vmul.f32 %v2066_v17, %v2059_v16  ;;  %v2261_v17 = vsel %vm2250_vm0, %v2338_v15, 0.0 }
0x2c6f   :  { %2070 = vrot.lane.b32.xlu0 %v2068_v18, %s2898_s19 }
0x2c73   :  { %2099 = vrot.lane.b32.xlu0 %v3345_v63, %s2898_s19  ;;  %v2087_v63 = vld [vmem:[%s3453_s9 + $0x8] sm:$0xff] }
0x2c74   :  { %2659 = vmatprep.subr.mxu1 %v2087_v63 }
0x2c75   :  { %2660 = vmatpush3.msra.mxu1 %v2087_v63 }
0x2c76   :  { %2661 = vmatprep.subr.mxu1 %v2086_v22 }
0x2c77   :  { %2662 = vmatpush3.msra.mxu1 %v2086_v22 }
0x2ce1   :  { %v2071_v23 = vpop.permute.xlu0 %2070 }
0x2ce2   :  { %v2073_v25 = vadd.f32 %v2071_v23, %v2063_v7 }
0x2ce4   :  { %2804 = vtanh.f32 %v2073_v25 }
0x2ce5   :  { %v2100_v20 = vpop.permute.xlu0 %2099 }
0x2ce6   :  { %2663 = vmatprep.mubr.msk.f32.mxu1 %vm274_vm9, %v2100_v20 }
0x2cf1   :  { %v2805_v57 = vpop.eup %2804 }
0x2cf2   :  { %2076 = vrot.lane.b32.xlu1 %v2805_v57, %s2897_s5 }
0x2d64   :  { %v2077_v27 = vpop.permute.xlu1 %2076 }
0x2d65   :  { %v2079_v28 = vmul.f32 %v2077_v27, %v2059_v16  ;;  %v2260_v16 = vsel %vm2250_vm0, %v2337_v13, 0.0 }
0x2d66   :  { %v2262_v18 = vadd.f32 %v2261_v17, %v2260_v16 }
0x2d67   :  { %v2085_v30 = vsel %vm1128_vm11, %v2084_v4, %v2079_v28 }
0x2d68   :  { %2101 = vrot.lane.b32.xlu1 %v2085_v30, %s2898_s19  ;;  %v2263_v35 = vrot.slane %v2262_v18, 4 }
0x2d6a   :  { %v2264_v7 = vadd.f32 %v2263_v35, %v2262_v18 }
0x2d6c   :  { %v2265_v23 = vrot.slane %v2264_v7, 2 }
0x2d6e   :  { %v2266_v25 = vadd.f32 %v2265_v23, %v2264_v7 }
0x2dda   :  { %v2102_v19 = vpop.permute.xlu1 %2101 }
0x2ddb   :  { %2664 = vmatmul.mubr.msk.f32.vlgmr.msra.gmra.mxu1 %vm274_vm9, %v2102_v19 }
0x2e9b   :  { %v2665_v24 = vpop.f32.mrf.mxu1 }
0x2e9c   :  { %v2179_v33 = vadd.f32 %v2665_v24, %v2334_v32 }
0x2e9d   :  { %v2173_v26 = vpop.f32.mrf.mxu1 }
0x2e9e   :  { %v2174_v34 = vadd.f32 %v2334_v32, %v2173_v26  ;;  %2184 = vmax.xlane.f32.xlu1 %v2179_v33 }
0x2ea0   :  { %2182 = vmax.xlane.f32.xlu0 %v2174_v34 }
0x2f27   :  { %v2185_v37 = vpop.xlane.xlu1 %2184 }
0x2f28   :  { %v2187_v40 = vsub.f32 %v2179_v33, %v2185_v37 }
0x2f29   :  { %v2183_v39 = vpop.xlane.xlu0 %2182 }
0x2f2a   :  { %v2186_v41 = vsub.f32 %v2174_v34, %v2183_v39  ;;  %v2190_v43 = vmul.f32 1.442695, %v2187_v40 }
0x2f2c   :  { %v2188_v42 = vmul.f32 1.442695, %v2186_v41 }
0x2f2e   :  { %2806 = vpow2.f32 %v2188_v42 }
0x2f2f   :  { %2808 = vpow2.f32 %v2190_v43 }
0x2f3b   :  { %v2807_v44 = vpop.eup %2806 }
0x2f3c   :  { %2192 = vadd.xlane.f32.xlu0 %v2807_v44  ;;  %v2809_v45 = vpop.eup %2808 }
0x2f40   :  { %2194 = vadd.xlane.f32.xlu0 %v2809_v45 }
0x2fc5   :  { %v2193_v46 = vpop.xlane.xlu0 %2192 }
0x2fc6   :  { %2810 = vlog2.f32 %v2193_v46 }
0x2fc9   :  { %v2195_v47 = vpop.xlane.xlu0 %2194 }
0x2fca   :  { %2812 = vlog2.f32 %v2195_v47 }
0x2fd3   :  { %v2811_v48 = vpop.eup %2810 }
0x2fd4   :  { %v2197_v49 = vmul.f32 0.6931472, %v2811_v48 }
0x2fd6   :  { %v2200_v50 = vsub.f32 %v2186_v41, %v2197_v49 }
0x2fd7   :  { %v2813_v51 = vpop.eup %2812 }
0x2fd8   :  { %v2199_v31 = vmul.f32 0.6931472, %v2813_v51  ;;  %2206 = vmax.xlane.f32.xlu1 %v2200_v50  ;;  %2202 = vst [vmem:[%s3455_s11] sm:$0xff] %v2200_v50 }
0x2fda   :  { %v2201_v52 = vsub.f32 %v2187_v40, %v2199_v31 }
0x2fdc   :  { %2208 = vmax.xlane.f32.xlu0 %v2201_v52  ;;  %2203 = vst [vmem:[%s3455_s11 + $0x8] sm:$0xff] %v2201_v52  ;;  %s2281_s11 = sshll.u32 %s2899_s1, 4  ;;  %s2282_s11 = int_to_ptr.vmem [resolvable:$true] %s2281_s11 }
0x2fdd   :  { %s2864_s26 = scalar_lea.vmem %s2282_s11, 16  ;;  %s2868_s27 = scalar_lea.vmem %s2282_s11, 32 }
0x2fde   :  { %p2865_p10 = scmp.ne.s32.totalorder %s2282_s11, %s2864_s26  ;;  %p2869_p11 = scmp.lt.s32.totalorder %s2282_s11, %s2282_s11 }
0x2fdf   :  { %p2870_p12 = scmp.lt.s32.totalorder %s2868_s27, %s2864_s26 }
0x2fe1   :  { %p2871_p13 = por %p2870_p12, %p2869_p11 }
0x2fe3   :  { %p2872_p0 = pnand %p2871_p13, %p2865_p10 }
0x3061   :  { %v2207_v53 = vpop.xlane.xlu1 %2206 }
0x3062   :  { %v2210_v54 = vsub.f32 %v2200_v50, %v2207_v53 }
0x3064   :  { %v2212_v55 = vmul.f32 1.442695, %v2210_v54 }
0x3065   :  { %v2209_v56 = vpop.xlane.xlu0 %2208 }
0x3066   :  { %2814 = vpow2.f32 %v2212_v55  ;;  %v2211_v38 = vsub.f32 %v2201_v52, %v2209_v56 }
0x3068   :  { %v2214_v58 = vmul.f32 1.442695, %v2211_v38 }
0x306a   :  { %2816 = vpow2.f32 %v2214_v58 }
0x3073   :  { %v2815_v59 = vpop.eup %2814 }
0x3074   :  { %2216 = vadd.xlane.f32.xlu1 %v2815_v59 }
0x3077   :  { %v2817_v60 = vpop.eup %2816 }
0x3078   :  { %2218 = vadd.xlane.f32.xlu0 %v2817_v60 }
0x3085   :  { %2227 = vperm.xlu1 %2677, %v2204_v61  }
0x308e   :  { %2230 = vperm.xlu0 %2676, %v2205_v62  }
0x30fd   :  { %v2217_v0 = vpop.xlane.xlu1 %2216 }
0x30fe   :  { %2818 = vlog2.f32 %v2217_v0 }
0x3101   :  { %v2219_v2 = vpop.xlane.xlu0 %2218  ;;  %v2228_v3 = vpop.permute.xlu1 %2227 }
0x3102   :  { %2820 = vlog2.f32 %v2219_v2  ;;  %vm2232_vm12 = vcmp.eq.s32.totalorder %v3008_v14, %v2228_v3 }
0x3109   :  { %v2231_v10 = vpop.permute.xlu0 %2230 }
0x310a   :  { %vm2233_vm13 = vcmp.eq.s32.totalorder %v3008_v14, %v2231_v10  ;;  %v2267_v14 = vrot.slane %v2266_v25, 1 }
0x310b   :  { %v2819_v4 = vpop.eup %2818 }
0x310c   :  { %v2221_v5 = vmul.f32 0.6931472, %v2819_v4  ;;  %v2268_v21 = vadd.f32 %v2267_v14, %v2266_v25 }
0x310e   :  { %v2224_v6 = vsub.f32 %v2210_v54, %v2221_v5  ;;  %2822 = vrcp.f32 %v2268_v21 }
0x310f   :  { %v2821_v8 = vpop.eup %2820 }
0x3110   :  { %v2223_v9 = vmul.f32 0.6931472, %v2821_v8  ;;  %v2234_v11 = vsel %vm2232_vm12, %v2224_v6, 0.0 }
0x3111   :  { %2236 = vadd.xlane.f32.xlu1 %v2234_v11 }
0x3112   :  { %v2225_v12 = vsub.f32 %v2211_v38, %v2223_v9 }
0x3114   :  { %v2235_v29 = vsel %vm2233_vm13, %v2225_v12, 0.0 }
0x3115   :  { %2238 = vadd.xlane.f32.xlu0 %v2235_v29 }
0x311b   :  { %v2823_v34 = vpop.eup %2822 }
0x319a   :  { %v2237_v20 = vpop.xlane.xlu1 %2236 }
0x319b   :  { %v2240_v36 = vsub.f32 0.0, %v2237_v20 }
0x319d   :  { %v2248_v22 = vmul.f32 %v2337_v13, %v2240_v36 }
0x319e   :  { %v2239_v63 = vpop.xlane.xlu0 %2238 }
0x319f   :  { %v2241_v57 = vsub.f32 0.0, %v2239_v63  ;;  %v2251_v1 = vsel %vm2250_vm0, %v2248_v22, 0.0 }
0x31a1   :  { %v2249_v27 = vmul.f32 %v2338_v15, %v2241_v57 }
0x31a3   :  { %v2252_v28 = vsel %vm2250_vm0, %v2249_v27, 0.0 }
0x31a4   :  { %v2253_v30 = vadd.f32 %v2252_v28, %v2251_v1 }
0x31a6   :  { %v2254_v19 = vrot.slane %v2253_v30, 4 }
0x31a8   :  { %v2255_v32 = vadd.f32 %v2254_v19, %v2253_v30 }
0x31aa   :  { %v2256_v24 = vrot.slane %v2255_v32, 2 }
0x31ac   :  { %v2257_v33 = vadd.f32 %v2256_v24, %v2255_v32 }
0x31ae   :  { %v2258_v26 = vrot.slane %v2257_v33, 1 }
0x31b0   :  { %v2259_v37 = vadd.f32 %v2258_v26, %v2257_v33 }
0x31b2   :  { %v2270_v39 = vmul.f32 %v2823_v34, %v2259_v37 }
0x31b4   :  { %2272 = vst.msk [vmem:[#allocation7] sm:$0x1] %vm2271_vm1, %v2270_v39 }
0x31b5   :  { %2875 = shalt.err (!%p2872_p0)
}
0x31b6   :  { %2284 = dma.vmem_to_hbm [thread:$0]  %s2282_s11, 16, %s3456_s12, [#allocation4]  }
0x31b7   :  { %2888 = dma.done.wait [#allocation4], 16  }
0x31b8   :  { %2889 = vsyncadd [#allocation4], 4294967280 }
0x31b9   :  { %2290 = vsyncpa [#allocation3], 1 }
0x31ba   :  { %2291 = vsyncpa [#allocation6], 1 }
0x31bb   :  { %2292 = vsyncpa [#allocation4], 1 }

</bundles_post_ra>
